<compile_context>
chip_gen: v5e
topology: v5e:2x2
jax: 0.10.0
libtpu: 0.0.40
codegen_flags: <defaults>
</compile_context>

<pallas_src>
import functools

import jax
import jax.numpy as jnp
from jax.experimental import pallas as pl
from jax.experimental.pallas import tpu as pltpu

# ---------------- cfg (synthetic, small) ----------------
IMG_SIZE = (64, 64)            # (H, W)
RPN_POSITIVE_OVERLAP = 0.7
RPN_NEGATIVE_OVERLAP = 0.3
RPN_FG_FRACTION = 0.5
RPN_TOTAL_ANCHORS = 64

LANE = 128                     # TPU lane width
SUBLANE_BLOCK = 8 * LANE       # anchor axis padded to a multiple of this


def _anchor_refine_kernel(anchors_ref, gt_ref, out_ref, *, img_h, img_w, num_gt):
    """One grid step == one batch element n.

    anchors_ref: [4, Sp, 128]  (x1,y1,x2,y2) planes, anchors sublane/lane dense
    gt_ref:      [N*4*M]       flat gt boxes, whole array resident in SMEM
    out_ref:     [1, 5, Sp, 128]  rows 0-3 = tx/ty/tw/th, row 4 = labels
    """
    n = pl.program_id(0)
    gt_base = n * (4 * num_gt)

    ax1 = anchors_ref[0]          # [Sp, 128]
    ay1 = anchors_ref[1]
    ax2 = anchors_ref[2]
    ay2 = anchors_ref[3]

    # bbox_drop mask (padded dummy anchors fail it too).  Used so the per-gt
    # "best anchor" max and the a_hit positives run over kept anchors only,
    # matching the torch reference.
    keep = ((ax1 >= 0.0) & (ay1 >= 0.0) &
            (ax2 <= img_w - 1.0) & (ay2 <= img_h - 1.0))

    aw = ax2 - ax1 + 1.0
    ah = ay2 - ay1 + 1.0
    acx = ax1 + 0.5 * aw
    acy = ay1 + 0.5 * ah
    area_a = aw * ah

    # Running per-anchor reductions over gt boxes — no [M, X] intermediates.
    best_iou = jnp.full_like(ax1, -1.0)
    sel_x1 = jnp.zeros_like(ax1)
    sel_y1 = jnp.zeros_like(ax1)
    sel_x2 = jnp.zeros_like(ax1)
    sel_y2 = jnp.zeros_like(ax1)
    a_hit = jnp.zeros(ax1.shape, dtype=jnp.bool_)
    pos_any = jnp.zeros(ax1.shape, dtype=jnp.bool_)
    neg_any = jnp.zeros(ax1.shape, dtype=jnp.bool_)

    # TODO(synk): switch to lax.fori_loop(..., unroll=True) with a dynamic SMEM
    # index if num_gt grows beyond ~8 (bounds vreg live ranges).
    # TODO(synk): if gt_boxes are zero-padded to a fixed M in a real pipeline,
    # a per-gt validity mask must gate a_hit / pos_any / neg_any here.
    for m in range(num_gt):
        gx1 = gt_ref[gt_base + 4 * m + 0]        # SMEM scalar -> splat
        gy1 = gt_ref[gt_base + 4 * m + 1]
        gx2 = gt_ref[gt_base + 4 * m + 2]
        gy2 = gt_ref[gt_base + 4 * m + 3]

        # IoU of every anchor against gt box m (Faster-RCNN "+1" convention).
        iw = jnp.maximum(jnp.minimum(ax2, gx2) - jnp.maximum(ax1, gx1) + 1.0, 0.0)
        ih = jnp.maximum(jnp.minimum(ay2, gy2) - jnp.maximum(ay1, gy1) + 1.0, 0.0)
        inter = iw * ih                                          # [Sp, 128]
        area_g = (gx2 - gx1 + 1.0) * (gy2 - gy1 + 1.0)           # scalar
        # Exact division: this IoU feeds the 0.7/0.3 threshold compares, so no
        # approx reciprocal (EUP has slack; costs nothing in wall clock).
        iou = inter / (area_a + area_g - inter)

        # (a) anchor ties the per-gt best IoU over kept anchors (exact: the
        #     equality compares against a max of the SAME values).
        masked = jnp.where(keep, iou, -1.0)
        a_max = jnp.max(jnp.max(masked, axis=1, keepdims=True),
                        axis=0, keepdims=True)                   # [1, 1]
        a_hit = a_hit | (iou == a_max)
        # (b) anchor has IoU >= positive threshold with some gt box.
        pos_any = pos_any | (iou >= RPN_POSITIVE_OVERLAP)
        # negatives require no overlap >= negative threshold with any gt box.
        neg_any = neg_any | (iou >= RPN_NEGATIVE_OVERLAP)

        # Per-anchor argmax gt carried explicitly; strict '>' keeps the first
        # maximal gt on ties (torch.argmax behaviour).
        take = iou > best_iou
        best_iou = jnp.where(take, iou, best_iou)
        sel_x1 = jnp.where(take, gx1, sel_x1)
        sel_y1 = jnp.where(take, gy1, sel_y1)
        sel_x2 = jnp.where(take, gx2, sel_x2)
        sel_y2 = jnp.where(take, gy2, sel_y2)

    # ---- label assignment (positives override negatives, like reference) ----
    # a_hit is masked by `keep` so padded / out-of-image anchors never show up
    # as positives in the padded output (they are dropped by the glue gather).
    labels = jnp.where((a_hit & keep) | pos_any, 1.0,
                       jnp.where(neg_any, -1.0, 0.0))

    # ---- bbox_coefficients (standard Faster-RCNN box encoding) --------------
    gw = sel_x2 - sel_x1 + 1.0
    gh = sel_y2 - sel_y1 + 1.0
    gcx = sel_x1 + 0.5 * gw
    gcy = sel_y1 + 0.5 * gh
    inv_aw = 1.0 / aw            # exact, matches torch reference
    inv_ah = 1.0 / ah

    # Five dense [Sp,128] stores into a single fused output block.
    out_ref[0, 0, :, :] = (gcx - acx) * inv_aw          # tx
    out_ref[0, 1, :, :] = (gcy - acy) * inv_ah          # ty
    out_ref[0, 2, :, :] = jnp.log(gw * inv_aw)          # tw
    out_ref[0, 3, :, :] = jnp.log(gh * inv_ah)          # th
    out_ref[0, 4, :, :] = labels                        # raw labels (-1/0/1)


@functools.partial(jax.jit, static_argnums=(2, 3, 4))
def _refine_padded(anchors_r, gt_flat, img_size, n_batch, num_gt):
    """Run the Pallas kernel on the padded, static-shape anchor set.

    anchors_r: [4, Sp, 128] float32 (Sp multiple of 8)
    gt_flat:   [N*4*M] float32
    returns:   [N, 5, Sp, 128] float32 (rows 0-3 coeff, row 4 labels)
    """
    _, sp, lane = anchors_r.shape

    kernel = functools.partial(_anchor_refine_kernel,
                               img_h=float(img_size[0]),
                               img_w=float(img_size[1]),
                               num_gt=num_gt)

    out = pl.pallas_call(
        kernel,
        out_shape=jax.ShapeDtypeStruct((n_batch, 5, sp, lane), jnp.float32),
        grid=(n_batch,),
        in_specs=[
            # Grid-invariant anchors block (constant index_map -> no re-DMA).
            # NOTE: pl.Buffered(1) would save one redundant VMEM buffer on
            # v7x at very large X; skipped here for lowering safety.
            pl.BlockSpec((4, sp, lane), lambda n: (0, 0, 0)),
            # gt boxes live whole in SMEM (flat 1-D to avoid 2-D SMEM padding)
            pl.BlockSpec(memory_space=pltpu.MemorySpace.SMEM),
        ],
        out_specs=pl.BlockSpec((1, 5, sp, lane), lambda n: (n, 0, 0, 0)),
        compiler_params=pltpu.CompilerParams(
            dimension_semantics=("parallel",)),     # feeds v7x's 2nd TC
    )(anchors_r, gt_flat)

    return out


def _keep_at_most(labels, select_val, max_keep, rand):
    """Keep at most `max_keep` random elements with labels == select_val; set
    the rest of them to -1.  Single sort + threshold (no double argsort)."""
    n, x = labels.shape
    mask = labels == select_val
    score = jnp.where(mask, rand, jnp.inf)
    sorted_s = jnp.sort(score, axis=1)
    sorted_s = jnp.concatenate(
        [sorted_s, jnp.full((n, 1), jnp.inf, sorted_s.dtype)], axis=1)
    idx = jnp.clip(max_keep.astype(jnp.int32), 0, x)           # [N, 1]
    thr = jnp.take_along_axis(sorted_s, idx, axis=1)           # [N, 1]
    drop = mask & (score >= thr)
    return jnp.where(drop, -1.0, labels)


def _subsample(labels, key):
    """Random fg/bg subsampling (same keep-at-most policy as the reference's
    torch.randperm drop; RNG stream differs — jax.random instead of torch)."""
    n, _ = labels.shape
    max_fg = int(RPN_FG_FRACTION * RPN_TOTAL_ANCHORS)
    k_fg, k_bg = jax.random.split(key)

    labels = _keep_at_most(labels, 1.0,
                           jnp.full((n, 1), max_fg, jnp.int32),
                           jax.random.uniform(k_fg, labels.shape))

    num_fg = jnp.sum((labels == 1.0).astype(jnp.int32), axis=1, keepdims=True)
    max_bg = RPN_TOTAL_ANCHORS - num_fg
    labels = _keep_at_most(labels, 0.0, max_bg,
                           jax.random.uniform(k_bg, labels.shape))
    return labels


def anchor_refine(anchors, gt_boxes, img_size=IMG_SIZE, rng_key=None):
    """Pure-JAX wrapper reproducing AnchorRefine.forward.

    anchors:  [A, 4] float32
    gt_boxes: [N, M, 4] float32
    returns (labels [N, X], target_coeff [N, X, 4], anchors_idx [X,])
    """
    anchors = jnp.asarray(anchors, jnp.float32)
    gt_boxes = jnp.asarray(gt_boxes, jnp.float32)
    A = anchors.shape[0]
    N, M, _ = gt_boxes.shape

    # ---- sublane/lane-dense static padding of the anchor axis ----------------
    # Dummy anchors (coords -1e4) always fail bbox_drop, overlap nothing, and
    # are removed by the final gather; kernel shapes depend only on the padded
    # (static) count, never on the data-dependent kept count X.
    x_pad = max(SUBLANE_BLOCK,
                ((A + SUBLANE_BLOCK - 1) // SUBLANE_BLOCK) * SUBLANE_BLOCK)
    anchors_p = jnp.concatenate(
        [anchors, jnp.full((x_pad - A, 4), -1.0e4, jnp.float32)], axis=0)
    # [A,4] -> [4,Xp] -> [4,Sp,128]; anchor a lives at (a // 128, a % 128).
    anchors_r = anchors_p.T.reshape(4, x_pad // LANE, LANE)
    gt_flat = gt_boxes.reshape(N * 4 * M)                      # 1-D SMEM payload

    out = _refine_padded(anchors_r, gt_flat,
                         (int(img_size[0]), int(img_size[1])), N, M)
    out = out.reshape(N, 5, x_pad)
    coeff_full = out[:, 0:4, :]                                # [N, 4, Xp]
    labels_full = out[:, 4, :]                                 # [N, Xp]

    # ---- bbox_drop compaction (glue, eager) ----------------------------------
    # TODO(synk): jnp.nonzero has a data-dependent output size, so this gather
    # stays outside the static Pallas kernel / jit.  For a fixed feature map
    # anchors_idx could be precomputed once and reused across calls.
    x1, y1, x2, y2 = anchors[:, 0], anchors[:, 1], anchors[:, 2], anchors[:, 3]
    keep = (x1 >= 0) & (y1 >= 0) & (x2 <= img_size[1] - 1) & (y2 <= img_size[0] - 1)
    anchors_idx = jnp.nonzero(keep)[0]

    labels = labels_full[:, anchors_idx]                       # [N, X]
    # [N, 4, X] -> [N, X, 4] only to honour the reference contract; consumers
    # that accept row-major coeffs can skip this transpose.
    target_coeff = jnp.transpose(coeff_full[:, :, anchors_idx], (0, 2, 1))

    # ---- random fg/bg subsampling (glue) -------------------------------------
    if rng_key is None:
        rng_key = jax.random.PRNGKey(0)
    labels = _subsample(labels, rng_key)

    return labels, target_coeff, anchors_idx


if __name__ == "__main__":
    key = jax.random.PRNGKey(0)
    k1, k2, k3, k4, k5 = jax.random.split(key, 5)

    # Synthetic anchors: some fall outside the 64x64 image and get dropped.
    A = 160
    xy1 = jax.random.uniform(k1, (A, 2), minval=-16.0, maxval=48.0)
    wh = jax.random.uniform(k2, (A, 2), minval=8.0, maxval=24.0)
    anchors = jnp.concatenate([xy1, xy1 + wh], axis=1).astype(jnp.float32)

    # Synthetic gt boxes: N=2 images, M=5 gt boxes each.
    N, M = 2, 5
    gxy1 = jax.random.uniform(k3, (N, M, 2), minval=0.0, maxval=40.0)
    gwh = jax.random.uniform(k4, (N, M, 2), minval=8.0, maxval=20.0)
    gt_boxes = jnp.concatenate([gxy1, gxy1 + gwh], axis=2).astype(jnp.float32)

    labels, target_coeff, anchors_idx = anchor_refine(anchors, gt_boxes, rng_key=k5)
    jax.block_until_ready((labels, target_coeff, anchors_idx))

    X = int(anchors_idx.shape[0])
    assert labels.shape == (N, X)
    assert target_coeff.shape == (N, X, 4)
    assert bool(jnp.all((labels == -1.0) | (labels == 0.0) | (labels == 1.0)))
    assert bool(jnp.all(jnp.isfinite(target_coeff)))
    # fg/bg budget respected per image
    assert bool(jnp.all(jnp.sum((labels == 1.0), axis=1) <= RPN_TOTAL_ANCHORS))
    print("KERNEL_OK")
</pallas_src>

<mosaic_0001>
module attributes {stable_mosaic.version = 11 : i64} {
  func.func @_anchor_refine_kernel(%arg0: i32, %arg1: memref<4x8x128xf32, #tpu.memory_space<vmem>>, %arg2: memref<40xf32, #tpu.memory_space<smem>>, %arg3: memref<1x5x8x128xf32, #tpu.memory_space<vmem>>) attributes {dimension_semantics = [#tpu.dimension_semantics<parallel>], iteration_bounds = array<i64: 2>, scalar_prefetch = 0 : i64, scratch_operands = 0 : i64, tpu.core_type = #tpu.core_type<tc>, window_params = [{pipeline_mode = #tpu.pipeline_mode<synchronous>, transform_indices = @transform_0, window_bounds = array<i64: 4, 8, 128>}, {transform_indices = @transform_1, window_bounds = array<i64: 40>}, {transform_indices = @transform_2, window_bounds = array<i64: 1, 5, 8, 128>}]} {
    %c20_i32 = arith.constant 20 : i32
    %0 = arith.muli %arg0, %c20_i32 : i32
    %c0 = arith.constant 0 : index
    %c0_0 = arith.constant 0 : index
    %c0_1 = arith.constant 0 : index
    %1 = vector.load %arg1[%c0, %c0_0, %c0_1] : memref<4x8x128xf32, #tpu.memory_space<vmem>>, vector<1x8x128xf32>
    %2 = vector.shape_cast %1 : vector<1x8x128xf32> to vector<8x128xf32>
    %c1 = arith.constant 1 : index
    %c0_2 = arith.constant 0 : index
    %c0_3 = arith.constant 0 : index
    %3 = vector.load %arg1[%c1, %c0_2, %c0_3] : memref<4x8x128xf32, #tpu.memory_space<vmem>>, vector<1x8x128xf32>
    %4 = vector.shape_cast %3 : vector<1x8x128xf32> to vector<8x128xf32>
    %c2 = arith.constant 2 : index
    %c0_4 = arith.constant 0 : index
    %c0_5 = arith.constant 0 : index
    %5 = vector.load %arg1[%c2, %c0_4, %c0_5] : memref<4x8x128xf32, #tpu.memory_space<vmem>>, vector<1x8x128xf32>
    %6 = vector.shape_cast %5 : vector<1x8x128xf32> to vector<8x128xf32>
    %c3 = arith.constant 3 : index
    %c0_6 = arith.constant 0 : index
    %c0_7 = arith.constant 0 : index
    %7 = vector.load %arg1[%c3, %c0_6, %c0_7] : memref<4x8x128xf32, #tpu.memory_space<vmem>>, vector<1x8x128xf32>
    %8 = vector.shape_cast %7 : vector<1x8x128xf32> to vector<8x128xf32>
    %cst = arith.constant 0.000000e+00 : f32
    %9 = vector.broadcast %cst : f32 to vector<8x128xf32>
    %10 = arith.cmpf oge, %2, %9 : vector<8x128xf32>
    %cst_8 = arith.constant 0.000000e+00 : f32
    %11 = vector.broadcast %cst_8 : f32 to vector<8x128xf32>
    %12 = arith.cmpf oge, %4, %11 : vector<8x128xf32>
    %13 = arith.andi %10, %12 : vector<8x128xi1>
    %cst_9 = arith.constant 6.300000e+01 : f32
    %14 = vector.broadcast %cst_9 : f32 to vector<8x128xf32>
    %15 = arith.cmpf ole, %6, %14 : vector<8x128xf32>
    %16 = arith.andi %13, %15 : vector<8x128xi1>
    %cst_10 = arith.constant 6.300000e+01 : f32
    %17 = vector.broadcast %cst_10 : f32 to vector<8x128xf32>
    %18 = arith.cmpf ole, %8, %17 : vector<8x128xf32>
    %19 = arith.andi %16, %18 : vector<8x128xi1>
    %20 = arith.subf %6, %2 : vector<8x128xf32>
    %cst_11 = arith.constant 1.000000e+00 : f32
    %21 = vector.broadcast %cst_11 : f32 to vector<8x128xf32>
    %22 = arith.addf %20, %21 : vector<8x128xf32>
    %23 = arith.subf %8, %4 : vector<8x128xf32>
    %cst_12 = arith.constant 1.000000e+00 : f32
    %24 = vector.broadcast %cst_12 : f32 to vector<8x128xf32>
    %25 = arith.addf %23, %24 : vector<8x128xf32>
    %cst_13 = arith.constant 5.000000e-01 : f32
    %26 = vector.broadcast %cst_13 : f32 to vector<8x128xf32>
    %27 = arith.mulf %26, %22 : vector<8x128xf32>
    %28 = arith.addf %2, %27 : vector<8x128xf32>
    %cst_14 = arith.constant 5.000000e-01 : f32
    %29 = vector.broadcast %cst_14 : f32 to vector<8x128xf32>
    %30 = arith.mulf %29, %25 : vector<8x128xf32>
    %31 = arith.addf %4, %30 : vector<8x128xf32>
    %32 = arith.mulf %22, %25 : vector<8x128xf32>
    %cst_15 = arith.constant -1.000000e+00 : f32
    %33 = vector.broadcast %cst_15 : f32 to vector<8x128xf32>
    %cst_16 = arith.constant 0.000000e+00 : f32
    %34 = vector.broadcast %cst_16 : f32 to vector<8x128xf32>
    %cst_17 = arith.constant 0.000000e+00 : f32
    %35 = vector.broadcast %cst_17 : f32 to vector<8x128xf32>
    %cst_18 = arith.constant 0.000000e+00 : f32
    %36 = vector.broadcast %cst_18 : f32 to vector<8x128xf32>
    %cst_19 = arith.constant 0.000000e+00 : f32
    %37 = vector.broadcast %cst_19 : f32 to vector<8x128xf32>
    %false = arith.constant false
    %38 = vector.broadcast %false : i1 to vector<8x128xi1>
    %false_20 = arith.constant false
    %39 = vector.broadcast %false_20 : i1 to vector<8x128xi1>
    %false_21 = arith.constant false
    %40 = vector.broadcast %false_21 : i1 to vector<8x128xi1>
    %c0_i32 = arith.constant 0 : i32
    %41 = arith.addi %0, %c0_i32 : i32
    %c0_i32_22 = arith.constant 0 : i32
    %42 = arith.addi %41, %c0_i32_22 : i32
    %43 = arith.index_cast %42 : i32 to index
    %44 = memref.load %arg2[%43] : memref<40xf32, #tpu.memory_space<smem>>
    %c0_i32_23 = arith.constant 0 : i32
    %45 = arith.addi %0, %c0_i32_23 : i32
    %c1_i32 = arith.constant 1 : i32
    %46 = arith.addi %45, %c1_i32 : i32
    %47 = arith.index_cast %46 : i32 to index
    %48 = memref.load %arg2[%47] : memref<40xf32, #tpu.memory_space<smem>>
    %c0_i32_24 = arith.constant 0 : i32
    %49 = arith.addi %0, %c0_i32_24 : i32
    %c2_i32 = arith.constant 2 : i32
    %50 = arith.addi %49, %c2_i32 : i32
    %51 = arith.index_cast %50 : i32 to index
    %52 = memref.load %arg2[%51] : memref<40xf32, #tpu.memory_space<smem>>
    %c0_i32_25 = arith.constant 0 : i32
    %53 = arith.addi %0, %c0_i32_25 : i32
    %c3_i32 = arith.constant 3 : i32
    %54 = arith.addi %53, %c3_i32 : i32
    %55 = arith.index_cast %54 : i32 to index
    %56 = memref.load %arg2[%55] : memref<40xf32, #tpu.memory_space<smem>>
    %57 = vector.broadcast %52 : f32 to vector<8x128xf32>
    %58 = arith.minimumf %6, %57 : vector<8x128xf32>
    %59 = vector.broadcast %44 : f32 to vector<8x128xf32>
    %60 = arith.maximumf %2, %59 : vector<8x128xf32>
    %61 = arith.subf %58, %60 : vector<8x128xf32>
    %cst_26 = arith.constant 1.000000e+00 : f32
    %62 = vector.broadcast %cst_26 : f32 to vector<8x128xf32>
    %63 = arith.addf %61, %62 : vector<8x128xf32>
    %cst_27 = arith.constant 0.000000e+00 : f32
    %64 = vector.broadcast %cst_27 : f32 to vector<8x128xf32>
    %65 = arith.maximumf %63, %64 : vector<8x128xf32>
    %66 = vector.broadcast %56 : f32 to vector<8x128xf32>
    %67 = arith.minimumf %8, %66 : vector<8x128xf32>
    %68 = vector.broadcast %48 : f32 to vector<8x128xf32>
    %69 = arith.maximumf %4, %68 : vector<8x128xf32>
    %70 = arith.subf %67, %69 : vector<8x128xf32>
    %cst_28 = arith.constant 1.000000e+00 : f32
    %71 = vector.broadcast %cst_28 : f32 to vector<8x128xf32>
    %72 = arith.addf %70, %71 : vector<8x128xf32>
    %cst_29 = arith.constant 0.000000e+00 : f32
    %73 = vector.broadcast %cst_29 : f32 to vector<8x128xf32>
    %74 = arith.maximumf %72, %73 : vector<8x128xf32>
    %75 = arith.mulf %65, %74 : vector<8x128xf32>
    %76 = arith.subf %52, %44 : f32
    %cst_30 = arith.constant 1.000000e+00 : f32
    %77 = arith.addf %76, %cst_30 : f32
    %78 = arith.subf %56, %48 : f32
    %cst_31 = arith.constant 1.000000e+00 : f32
    %79 = arith.addf %78, %cst_31 : f32
    %80 = arith.mulf %77, %79 : f32
    %81 = vector.broadcast %80 : f32 to vector<8x128xf32>
    %82 = arith.addf %32, %81 : vector<8x128xf32>
    %83 = arith.subf %82, %75 : vector<8x128xf32>
    %84 = arith.divf %75, %83 : vector<8x128xf32>
    %cst_32 = arith.constant -1.000000e+00 : f32
    %85 = vector.broadcast %cst_32 : f32 to vector<8x128xf32>
    %86 = arith.select %19, %84, %85 : vector<8x128xi1>, vector<8x128xf32>
    %cst_33 = arith.constant dense<0xFF800000> : vector<8xf32>
    %87 = vector.multi_reduction <maximumf>, %86, %cst_33 [1] : vector<8x128xf32> to vector<8xf32>
    %88 = vector.shape_cast %87 : vector<8xf32> to vector<8x1xf32>
    %cst_34 = arith.constant dense<0xFF800000> : vector<1xf32>
    %89 = vector.multi_reduction <maximumf>, %88, %cst_34 [0] : vector<8x1xf32> to vector<1xf32>
    %90 = vector.shape_cast %89 : vector<1xf32> to vector<1x1xf32>
    %91 = vector.broadcast %90 : vector<1x1xf32> to vector<8x128xf32>
    %92 = arith.cmpf oeq, %84, %91 : vector<8x128xf32>
    %93 = arith.ori %38, %92 : vector<8x128xi1>
    %cst_35 = arith.constant 0.699999988 : f32
    %94 = vector.broadcast %cst_35 : f32 to vector<8x128xf32>
    %95 = arith.cmpf oge, %84, %94 : vector<8x128xf32>
    %96 = arith.ori %39, %95 : vector<8x128xi1>
    %cst_36 = arith.constant 3.000000e-01 : f32
    %97 = vector.broadcast %cst_36 : f32 to vector<8x128xf32>
    %98 = arith.cmpf oge, %84, %97 : vector<8x128xf32>
    %99 = arith.ori %40, %98 : vector<8x128xi1>
    %100 = arith.cmpf ogt, %84, %33 : vector<8x128xf32>
    %101 = arith.select %100, %84, %33 : vector<8x128xi1>, vector<8x128xf32>
    %102 = vector.broadcast %44 : f32 to vector<8x128xf32>
    %103 = arith.select %100, %102, %34 : vector<8x128xi1>, vector<8x128xf32>
    %104 = vector.broadcast %48 : f32 to vector<8x128xf32>
    %105 = arith.select %100, %104, %35 : vector<8x128xi1>, vector<8x128xf32>
    %106 = vector.broadcast %52 : f32 to vector<8x128xf32>
    %107 = arith.select %100, %106, %36 : vector<8x128xi1>, vector<8x128xf32>
    %108 = vector.broadcast %56 : f32 to vector<8x128xf32>
    %109 = arith.select %100, %108, %37 : vector<8x128xi1>, vector<8x128xf32>
    %c4_i32 = arith.constant 4 : i32
    %110 = arith.addi %0, %c4_i32 : i32
    %c0_i32_37 = arith.constant 0 : i32
    %111 = arith.addi %110, %c0_i32_37 : i32
    %112 = arith.index_cast %111 : i32 to index
    %113 = memref.load %arg2[%112] : memref<40xf32, #tpu.memory_space<smem>>
    %c4_i32_38 = arith.constant 4 : i32
    %114 = arith.addi %0, %c4_i32_38 : i32
    %c1_i32_39 = arith.constant 1 : i32
    %115 = arith.addi %114, %c1_i32_39 : i32
    %116 = arith.index_cast %115 : i32 to index
    %117 = memref.load %arg2[%116] : memref<40xf32, #tpu.memory_space<smem>>
    %c4_i32_40 = arith.constant 4 : i32
    %118 = arith.addi %0, %c4_i32_40 : i32
    %c2_i32_41 = arith.constant 2 : i32
    %119 = arith.addi %118, %c2_i32_41 : i32
    %120 = arith.index_cast %119 : i32 to index
    %121 = memref.load %arg2[%120] : memref<40xf32, #tpu.memory_space<smem>>
    %c4_i32_42 = arith.constant 4 : i32
    %122 = arith.addi %0, %c4_i32_42 : i32
    %c3_i32_43 = arith.constant 3 : i32
    %123 = arith.addi %122, %c3_i32_43 : i32
    %124 = arith.index_cast %123 : i32 to index
    %125 = memref.load %arg2[%124] : memref<40xf32, #tpu.memory_space<smem>>
    %126 = vector.broadcast %121 : f32 to vector<8x128xf32>
    %127 = arith.minimumf %6, %126 : vector<8x128xf32>
    %128 = vector.broadcast %113 : f32 to vector<8x128xf32>
    %129 = arith.maximumf %2, %128 : vector<8x128xf32>
    %130 = arith.subf %127, %129 : vector<8x128xf32>
    %cst_44 = arith.constant 1.000000e+00 : f32
    %131 = vector.broadcast %cst_44 : f32 to vector<8x128xf32>
    %132 = arith.addf %130, %131 : vector<8x128xf32>
    %cst_45 = arith.constant 0.000000e+00 : f32
    %133 = vector.broadcast %cst_45 : f32 to vector<8x128xf32>
    %134 = arith.maximumf %132, %133 : vector<8x128xf32>
    %135 = vector.broadcast %125 : f32 to vector<8x128xf32>
    %136 = arith.minimumf %8, %135 : vector<8x128xf32>
    %137 = vector.broadcast %117 : f32 to vector<8x128xf32>
    %138 = arith.maximumf %4, %137 : vector<8x128xf32>
    %139 = arith.subf %136, %138 : vector<8x128xf32>
    %cst_46 = arith.constant 1.000000e+00 : f32
    %140 = vector.broadcast %cst_46 : f32 to vector<8x128xf32>
    %141 = arith.addf %139, %140 : vector<8x128xf32>
    %cst_47 = arith.constant 0.000000e+00 : f32
    %142 = vector.broadcast %cst_47 : f32 to vector<8x128xf32>
    %143 = arith.maximumf %141, %142 : vector<8x128xf32>
    %144 = arith.mulf %134, %143 : vector<8x128xf32>
    %145 = arith.subf %121, %113 : f32
    %cst_48 = arith.constant 1.000000e+00 : f32
    %146 = arith.addf %145, %cst_48 : f32
    %147 = arith.subf %125, %117 : f32
    %cst_49 = arith.constant 1.000000e+00 : f32
    %148 = arith.addf %147, %cst_49 : f32
    %149 = arith.mulf %146, %148 : f32
    %150 = vector.broadcast %149 : f32 to vector<8x128xf32>
    %151 = arith.addf %32, %150 : vector<8x128xf32>
    %152 = arith.subf %151, %144 : vector<8x128xf32>
    %153 = arith.divf %144, %152 : vector<8x128xf32>
    %cst_50 = arith.constant -1.000000e+00 : f32
    %154 = vector.broadcast %cst_50 : f32 to vector<8x128xf32>
    %155 = arith.select %19, %153, %154 : vector<8x128xi1>, vector<8x128xf32>
    %cst_51 = arith.constant dense<0xFF800000> : vector<8xf32>
    %156 = vector.multi_reduction <maximumf>, %155, %cst_51 [1] : vector<8x128xf32> to vector<8xf32>
    %157 = vector.shape_cast %156 : vector<8xf32> to vector<8x1xf32>
    %cst_52 = arith.constant dense<0xFF800000> : vector<1xf32>
    %158 = vector.multi_reduction <maximumf>, %157, %cst_52 [0] : vector<8x1xf32> to vector<1xf32>
    %159 = vector.shape_cast %158 : vector<1xf32> to vector<1x1xf32>
    %160 = vector.broadcast %159 : vector<1x1xf32> to vector<8x128xf32>
    %161 = arith.cmpf oeq, %153, %160 : vector<8x128xf32>
    %162 = arith.ori %93, %161 : vector<8x128xi1>
    %cst_53 = arith.constant 0.699999988 : f32
    %163 = vector.broadcast %cst_53 : f32 to vector<8x128xf32>
    %164 = arith.cmpf oge, %153, %163 : vector<8x128xf32>
    %165 = arith.ori %96, %164 : vector<8x128xi1>
    %cst_54 = arith.constant 3.000000e-01 : f32
    %166 = vector.broadcast %cst_54 : f32 to vector<8x128xf32>
    %167 = arith.cmpf oge, %153, %166 : vector<8x128xf32>
    %168 = arith.ori %99, %167 : vector<8x128xi1>
    %169 = arith.cmpf ogt, %153, %101 : vector<8x128xf32>
    %170 = arith.select %169, %153, %101 : vector<8x128xi1>, vector<8x128xf32>
    %171 = vector.broadcast %113 : f32 to vector<8x128xf32>
    %172 = arith.select %169, %171, %103 : vector<8x128xi1>, vector<8x128xf32>
    %173 = vector.broadcast %117 : f32 to vector<8x128xf32>
    %174 = arith.select %169, %173, %105 : vector<8x128xi1>, vector<8x128xf32>
    %175 = vector.broadcast %121 : f32 to vector<8x128xf32>
    %176 = arith.select %169, %175, %107 : vector<8x128xi1>, vector<8x128xf32>
    %177 = vector.broadcast %125 : f32 to vector<8x128xf32>
    %178 = arith.select %169, %177, %109 : vector<8x128xi1>, vector<8x128xf32>
    %c8_i32 = arith.constant 8 : i32
    %179 = arith.addi %0, %c8_i32 : i32
    %c0_i32_55 = arith.constant 0 : i32
    %180 = arith.addi %179, %c0_i32_55 : i32
    %181 = arith.index_cast %180 : i32 to index
    %182 = memref.load %arg2[%181] : memref<40xf32, #tpu.memory_space<smem>>
    %c8_i32_56 = arith.constant 8 : i32
    %183 = arith.addi %0, %c8_i32_56 : i32
    %c1_i32_57 = arith.constant 1 : i32
    %184 = arith.addi %183, %c1_i32_57 : i32
    %185 = arith.index_cast %184 : i32 to index
    %186 = memref.load %arg2[%185] : memref<40xf32, #tpu.memory_space<smem>>
    %c8_i32_58 = arith.constant 8 : i32
    %187 = arith.addi %0, %c8_i32_58 : i32
    %c2_i32_59 = arith.constant 2 : i32
    %188 = arith.addi %187, %c2_i32_59 : i32
    %189 = arith.index_cast %188 : i32 to index
    %190 = memref.load %arg2[%189] : memref<40xf32, #tpu.memory_space<smem>>
    %c8_i32_60 = arith.constant 8 : i32
    %191 = arith.addi %0, %c8_i32_60 : i32
    %c3_i32_61 = arith.constant 3 : i32
    %192 = arith.addi %191, %c3_i32_61 : i32
    %193 = arith.index_cast %192 : i32 to index
    %194 = memref.load %arg2[%193] : memref<40xf32, #tpu.memory_space<smem>>
    %195 = vector.broadcast %190 : f32 to vector<8x128xf32>
    %196 = arith.minimumf %6, %195 : vector<8x128xf32>
    %197 = vector.broadcast %182 : f32 to vector<8x128xf32>
    %198 = arith.maximumf %2, %197 : vector<8x128xf32>
    %199 = arith.subf %196, %198 : vector<8x128xf32>
    %cst_62 = arith.constant 1.000000e+00 : f32
    %200 = vector.broadcast %cst_62 : f32 to vector<8x128xf32>
    %201 = arith.addf %199, %200 : vector<8x128xf32>
    %cst_63 = arith.constant 0.000000e+00 : f32
    %202 = vector.broadcast %cst_63 : f32 to vector<8x128xf32>
    %203 = arith.maximumf %201, %202 : vector<8x128xf32>
    %204 = vector.broadcast %194 : f32 to vector<8x128xf32>
    %205 = arith.minimumf %8, %204 : vector<8x128xf32>
    %206 = vector.broadcast %186 : f32 to vector<8x128xf32>
    %207 = arith.maximumf %4, %206 : vector<8x128xf32>
    %208 = arith.subf %205, %207 : vector<8x128xf32>
    %cst_64 = arith.constant 1.000000e+00 : f32
    %209 = vector.broadcast %cst_64 : f32 to vector<8x128xf32>
    %210 = arith.addf %208, %209 : vector<8x128xf32>
    %cst_65 = arith.constant 0.000000e+00 : f32
    %211 = vector.broadcast %cst_65 : f32 to vector<8x128xf32>
    %212 = arith.maximumf %210, %211 : vector<8x128xf32>
    %213 = arith.mulf %203, %212 : vector<8x128xf32>
    %214 = arith.subf %190, %182 : f32
    %cst_66 = arith.constant 1.000000e+00 : f32
    %215 = arith.addf %214, %cst_66 : f32
    %216 = arith.subf %194, %186 : f32
    %cst_67 = arith.constant 1.000000e+00 : f32
    %217 = arith.addf %216, %cst_67 : f32
    %218 = arith.mulf %215, %217 : f32
    %219 = vector.broadcast %218 : f32 to vector<8x128xf32>
    %220 = arith.addf %32, %219 : vector<8x128xf32>
    %221 = arith.subf %220, %213 : vector<8x128xf32>
    %222 = arith.divf %213, %221 : vector<8x128xf32>
    %cst_68 = arith.constant -1.000000e+00 : f32
    %223 = vector.broadcast %cst_68 : f32 to vector<8x128xf32>
    %224 = arith.select %19, %222, %223 : vector<8x128xi1>, vector<8x128xf32>
    %cst_69 = arith.constant dense<0xFF800000> : vector<8xf32>
    %225 = vector.multi_reduction <maximumf>, %224, %cst_69 [1] : vector<8x128xf32> to vector<8xf32>
    %226 = vector.shape_cast %225 : vector<8xf32> to vector<8x1xf32>
    %cst_70 = arith.constant dense<0xFF800000> : vector<1xf32>
    %227 = vector.multi_reduction <maximumf>, %226, %cst_70 [0] : vector<8x1xf32> to vector<1xf32>
    %228 = vector.shape_cast %227 : vector<1xf32> to vector<1x1xf32>
    %229 = vector.broadcast %228 : vector<1x1xf32> to vector<8x128xf32>
    %230 = arith.cmpf oeq, %222, %229 : vector<8x128xf32>
    %231 = arith.ori %162, %230 : vector<8x128xi1>
    %cst_71 = arith.constant 0.699999988 : f32
    %232 = vector.broadcast %cst_71 : f32 to vector<8x128xf32>
    %233 = arith.cmpf oge, %222, %232 : vector<8x128xf32>
    %234 = arith.ori %165, %233 : vector<8x128xi1>
    %cst_72 = arith.constant 3.000000e-01 : f32
    %235 = vector.broadcast %cst_72 : f32 to vector<8x128xf32>
    %236 = arith.cmpf oge, %222, %235 : vector<8x128xf32>
    %237 = arith.ori %168, %236 : vector<8x128xi1>
    %238 = arith.cmpf ogt, %222, %170 : vector<8x128xf32>
    %239 = arith.select %238, %222, %170 : vector<8x128xi1>, vector<8x128xf32>
    %240 = vector.broadcast %182 : f32 to vector<8x128xf32>
    %241 = arith.select %238, %240, %172 : vector<8x128xi1>, vector<8x128xf32>
    %242 = vector.broadcast %186 : f32 to vector<8x128xf32>
    %243 = arith.select %238, %242, %174 : vector<8x128xi1>, vector<8x128xf32>
    %244 = vector.broadcast %190 : f32 to vector<8x128xf32>
    %245 = arith.select %238, %244, %176 : vector<8x128xi1>, vector<8x128xf32>
    %246 = vector.broadcast %194 : f32 to vector<8x128xf32>
    %247 = arith.select %238, %246, %178 : vector<8x128xi1>, vector<8x128xf32>
    %c12_i32 = arith.constant 12 : i32
    %248 = arith.addi %0, %c12_i32 : i32
    %c0_i32_73 = arith.constant 0 : i32
    %249 = arith.addi %248, %c0_i32_73 : i32
    %250 = arith.index_cast %249 : i32 to index
    %251 = memref.load %arg2[%250] : memref<40xf32, #tpu.memory_space<smem>>
    %c12_i32_74 = arith.constant 12 : i32
    %252 = arith.addi %0, %c12_i32_74 : i32
    %c1_i32_75 = arith.constant 1 : i32
    %253 = arith.addi %252, %c1_i32_75 : i32
    %254 = arith.index_cast %253 : i32 to index
    %255 = memref.load %arg2[%254] : memref<40xf32, #tpu.memory_space<smem>>
    %c12_i32_76 = arith.constant 12 : i32
    %256 = arith.addi %0, %c12_i32_76 : i32
    %c2_i32_77 = arith.constant 2 : i32
    %257 = arith.addi %256, %c2_i32_77 : i32
    %258 = arith.index_cast %257 : i32 to index
    %259 = memref.load %arg2[%258] : memref<40xf32, #tpu.memory_space<smem>>
    %c12_i32_78 = arith.constant 12 : i32
    %260 = arith.addi %0, %c12_i32_78 : i32
    %c3_i32_79 = arith.constant 3 : i32
    %261 = arith.addi %260, %c3_i32_79 : i32
    %262 = arith.index_cast %261 : i32 to index
    %263 = memref.load %arg2[%262] : memref<40xf32, #tpu.memory_space<smem>>
    %264 = vector.broadcast %259 : f32 to vector<8x128xf32>
    %265 = arith.minimumf %6, %264 : vector<8x128xf32>
    %266 = vector.broadcast %251 : f32 to vector<8x128xf32>
    %267 = arith.maximumf %2, %266 : vector<8x128xf32>
    %268 = arith.subf %265, %267 : vector<8x128xf32>
    %cst_80 = arith.constant 1.000000e+00 : f32
    %269 = vector.broadcast %cst_80 : f32 to vector<8x128xf32>
    %270 = arith.addf %268, %269 : vector<8x128xf32>
    %cst_81 = arith.constant 0.000000e+00 : f32
    %271 = vector.broadcast %cst_81 : f32 to vector<8x128xf32>
    %272 = arith.maximumf %270, %271 : vector<8x128xf32>
    %273 = vector.broadcast %263 : f32 to vector<8x128xf32>
    %274 = arith.minimumf %8, %273 : vector<8x128xf32>
    %275 = vector.broadcast %255 : f32 to vector<8x128xf32>
    %276 = arith.maximumf %4, %275 : vector<8x128xf32>
    %277 = arith.subf %274, %276 : vector<8x128xf32>
    %cst_82 = arith.constant 1.000000e+00 : f32
    %278 = vector.broadcast %cst_82 : f32 to vector<8x128xf32>
    %279 = arith.addf %277, %278 : vector<8x128xf32>
    %cst_83 = arith.constant 0.000000e+00 : f32
    %280 = vector.broadcast %cst_83 : f32 to vector<8x128xf32>
    %281 = arith.maximumf %279, %280 : vector<8x128xf32>
    %282 = arith.mulf %272, %281 : vector<8x128xf32>
    %283 = arith.subf %259, %251 : f32
    %cst_84 = arith.constant 1.000000e+00 : f32
    %284 = arith.addf %283, %cst_84 : f32
    %285 = arith.subf %263, %255 : f32
    %cst_85 = arith.constant 1.000000e+00 : f32
    %286 = arith.addf %285, %cst_85 : f32
    %287 = arith.mulf %284, %286 : f32
    %288 = vector.broadcast %287 : f32 to vector<8x128xf32>
    %289 = arith.addf %32, %288 : vector<8x128xf32>
    %290 = arith.subf %289, %282 : vector<8x128xf32>
    %291 = arith.divf %282, %290 : vector<8x128xf32>
    %cst_86 = arith.constant -1.000000e+00 : f32
    %292 = vector.broadcast %cst_86 : f32 to vector<8x128xf32>
    %293 = arith.select %19, %291, %292 : vector<8x128xi1>, vector<8x128xf32>
    %cst_87 = arith.constant dense<0xFF800000> : vector<8xf32>
    %294 = vector.multi_reduction <maximumf>, %293, %cst_87 [1] : vector<8x128xf32> to vector<8xf32>
    %295 = vector.shape_cast %294 : vector<8xf32> to vector<8x1xf32>
    %cst_88 = arith.constant dense<0xFF800000> : vector<1xf32>
    %296 = vector.multi_reduction <maximumf>, %295, %cst_88 [0] : vector<8x1xf32> to vector<1xf32>
    %297 = vector.shape_cast %296 : vector<1xf32> to vector<1x1xf32>
    %298 = vector.broadcast %297 : vector<1x1xf32> to vector<8x128xf32>
    %299 = arith.cmpf oeq, %291, %298 : vector<8x128xf32>
    %300 = arith.ori %231, %299 : vector<8x128xi1>
    %cst_89 = arith.constant 0.699999988 : f32
    %301 = vector.broadcast %cst_89 : f32 to vector<8x128xf32>
    %302 = arith.cmpf oge, %291, %301 : vector<8x128xf32>
    %303 = arith.ori %234, %302 : vector<8x128xi1>
    %cst_90 = arith.constant 3.000000e-01 : f32
    %304 = vector.broadcast %cst_90 : f32 to vector<8x128xf32>
    %305 = arith.cmpf oge, %291, %304 : vector<8x128xf32>
    %306 = arith.ori %237, %305 : vector<8x128xi1>
    %307 = arith.cmpf ogt, %291, %239 : vector<8x128xf32>
    %308 = arith.select %307, %291, %239 : vector<8x128xi1>, vector<8x128xf32>
    %309 = vector.broadcast %251 : f32 to vector<8x128xf32>
    %310 = arith.select %307, %309, %241 : vector<8x128xi1>, vector<8x128xf32>
    %311 = vector.broadcast %255 : f32 to vector<8x128xf32>
    %312 = arith.select %307, %311, %243 : vector<8x128xi1>, vector<8x128xf32>
    %313 = vector.broadcast %259 : f32 to vector<8x128xf32>
    %314 = arith.select %307, %313, %245 : vector<8x128xi1>, vector<8x128xf32>
    %315 = vector.broadcast %263 : f32 to vector<8x128xf32>
    %316 = arith.select %307, %315, %247 : vector<8x128xi1>, vector<8x128xf32>
    %c16_i32 = arith.constant 16 : i32
    %317 = arith.addi %0, %c16_i32 : i32
    %c0_i32_91 = arith.constant 0 : i32
    %318 = arith.addi %317, %c0_i32_91 : i32
    %319 = arith.index_cast %318 : i32 to index
    %320 = memref.load %arg2[%319] : memref<40xf32, #tpu.memory_space<smem>>
    %c16_i32_92 = arith.constant 16 : i32
    %321 = arith.addi %0, %c16_i32_92 : i32
    %c1_i32_93 = arith.constant 1 : i32
    %322 = arith.addi %321, %c1_i32_93 : i32
    %323 = arith.index_cast %322 : i32 to index
    %324 = memref.load %arg2[%323] : memref<40xf32, #tpu.memory_space<smem>>
    %c16_i32_94 = arith.constant 16 : i32
    %325 = arith.addi %0, %c16_i32_94 : i32
    %c2_i32_95 = arith.constant 2 : i32
    %326 = arith.addi %325, %c2_i32_95 : i32
    %327 = arith.index_cast %326 : i32 to index
    %328 = memref.load %arg2[%327] : memref<40xf32, #tpu.memory_space<smem>>
    %c16_i32_96 = arith.constant 16 : i32
    %329 = arith.addi %0, %c16_i32_96 : i32
    %c3_i32_97 = arith.constant 3 : i32
    %330 = arith.addi %329, %c3_i32_97 : i32
    %331 = arith.index_cast %330 : i32 to index
    %332 = memref.load %arg2[%331] : memref<40xf32, #tpu.memory_space<smem>>
    %333 = vector.broadcast %328 : f32 to vector<8x128xf32>
    %334 = arith.minimumf %6, %333 : vector<8x128xf32>
    %335 = vector.broadcast %320 : f32 to vector<8x128xf32>
    %336 = arith.maximumf %2, %335 : vector<8x128xf32>
    %337 = arith.subf %334, %336 : vector<8x128xf32>
    %cst_98 = arith.constant 1.000000e+00 : f32
    %338 = vector.broadcast %cst_98 : f32 to vector<8x128xf32>
    %339 = arith.addf %337, %338 : vector<8x128xf32>
    %cst_99 = arith.constant 0.000000e+00 : f32
    %340 = vector.broadcast %cst_99 : f32 to vector<8x128xf32>
    %341 = arith.maximumf %339, %340 : vector<8x128xf32>
    %342 = vector.broadcast %332 : f32 to vector<8x128xf32>
    %343 = arith.minimumf %8, %342 : vector<8x128xf32>
    %344 = vector.broadcast %324 : f32 to vector<8x128xf32>
    %345 = arith.maximumf %4, %344 : vector<8x128xf32>
    %346 = arith.subf %343, %345 : vector<8x128xf32>
    %cst_100 = arith.constant 1.000000e+00 : f32
    %347 = vector.broadcast %cst_100 : f32 to vector<8x128xf32>
    %348 = arith.addf %346, %347 : vector<8x128xf32>
    %cst_101 = arith.constant 0.000000e+00 : f32
    %349 = vector.broadcast %cst_101 : f32 to vector<8x128xf32>
    %350 = arith.maximumf %348, %349 : vector<8x128xf32>
    %351 = arith.mulf %341, %350 : vector<8x128xf32>
    %352 = arith.subf %328, %320 : f32
    %cst_102 = arith.constant 1.000000e+00 : f32
    %353 = arith.addf %352, %cst_102 : f32
    %354 = arith.subf %332, %324 : f32
    %cst_103 = arith.constant 1.000000e+00 : f32
    %355 = arith.addf %354, %cst_103 : f32
    %356 = arith.mulf %353, %355 : f32
    %357 = vector.broadcast %356 : f32 to vector<8x128xf32>
    %358 = arith.addf %32, %357 : vector<8x128xf32>
    %359 = arith.subf %358, %351 : vector<8x128xf32>
    %360 = arith.divf %351, %359 : vector<8x128xf32>
    %cst_104 = arith.constant -1.000000e+00 : f32
    %361 = vector.broadcast %cst_104 : f32 to vector<8x128xf32>
    %362 = arith.select %19, %360, %361 : vector<8x128xi1>, vector<8x128xf32>
    %cst_105 = arith.constant dense<0xFF800000> : vector<8xf32>
    %363 = vector.multi_reduction <maximumf>, %362, %cst_105 [1] : vector<8x128xf32> to vector<8xf32>
    %364 = vector.shape_cast %363 : vector<8xf32> to vector<8x1xf32>
    %cst_106 = arith.constant dense<0xFF800000> : vector<1xf32>
    %365 = vector.multi_reduction <maximumf>, %364, %cst_106 [0] : vector<8x1xf32> to vector<1xf32>
    %366 = vector.shape_cast %365 : vector<1xf32> to vector<1x1xf32>
    %367 = vector.broadcast %366 : vector<1x1xf32> to vector<8x128xf32>
    %368 = arith.cmpf oeq, %360, %367 : vector<8x128xf32>
    %369 = arith.ori %300, %368 : vector<8x128xi1>
    %cst_107 = arith.constant 0.699999988 : f32
    %370 = vector.broadcast %cst_107 : f32 to vector<8x128xf32>
    %371 = arith.cmpf oge, %360, %370 : vector<8x128xf32>
    %372 = arith.ori %303, %371 : vector<8x128xi1>
    %cst_108 = arith.constant 3.000000e-01 : f32
    %373 = vector.broadcast %cst_108 : f32 to vector<8x128xf32>
    %374 = arith.cmpf oge, %360, %373 : vector<8x128xf32>
    %375 = arith.ori %306, %374 : vector<8x128xi1>
    %376 = arith.cmpf ogt, %360, %308 : vector<8x128xf32>
    %377 = vector.broadcast %320 : f32 to vector<8x128xf32>
    %378 = arith.select %376, %377, %310 : vector<8x128xi1>, vector<8x128xf32>
    %379 = vector.broadcast %324 : f32 to vector<8x128xf32>
    %380 = arith.select %376, %379, %312 : vector<8x128xi1>, vector<8x128xf32>
    %381 = vector.broadcast %328 : f32 to vector<8x128xf32>
    %382 = arith.select %376, %381, %314 : vector<8x128xi1>, vector<8x128xf32>
    %383 = vector.broadcast %332 : f32 to vector<8x128xf32>
    %384 = arith.select %376, %383, %316 : vector<8x128xi1>, vector<8x128xf32>
    %385 = arith.andi %369, %19 : vector<8x128xi1>
    %386 = arith.ori %385, %372 : vector<8x128xi1>
    %cst_109 = arith.constant -1.000000e+00 : f32
    %cst_110 = arith.constant 0.000000e+00 : f32
    %387 = vector.broadcast %cst_109 : f32 to vector<8x128xf32>
    %388 = vector.broadcast %cst_110 : f32 to vector<8x128xf32>
    %389 = arith.select %375, %387, %388 : vector<8x128xi1>, vector<8x128xf32>
    %cst_111 = arith.constant 1.000000e+00 : f32
    %390 = vector.broadcast %cst_111 : f32 to vector<8x128xf32>
    %391 = arith.select %386, %390, %389 : vector<8x128xi1>, vector<8x128xf32>
    %392 = arith.subf %382, %378 : vector<8x128xf32>
    %cst_112 = arith.constant 1.000000e+00 : f32
    %393 = vector.broadcast %cst_112 : f32 to vector<8x128xf32>
    %394 = arith.addf %392, %393 : vector<8x128xf32>
    %395 = arith.subf %384, %380 : vector<8x128xf32>
    %cst_113 = arith.constant 1.000000e+00 : f32
    %396 = vector.broadcast %cst_113 : f32 to vector<8x128xf32>
    %397 = arith.addf %395, %396 : vector<8x128xf32>
    %cst_114 = arith.constant 5.000000e-01 : f32
    %398 = vector.broadcast %cst_114 : f32 to vector<8x128xf32>
    %399 = arith.mulf %398, %394 : vector<8x128xf32>
    %400 = arith.addf %378, %399 : vector<8x128xf32>
    %cst_115 = arith.constant 5.000000e-01 : f32
    %401 = vector.broadcast %cst_115 : f32 to vector<8x128xf32>
    %402 = arith.mulf %401, %397 : vector<8x128xf32>
    %403 = arith.addf %380, %402 : vector<8x128xf32>
    %cst_116 = arith.constant 1.000000e+00 : f32
    %404 = vector.broadcast %cst_116 : f32 to vector<8x128xf32>
    %405 = arith.divf %404, %22 : vector<8x128xf32>
    %cst_117 = arith.constant 1.000000e+00 : f32
    %406 = vector.broadcast %cst_117 : f32 to vector<8x128xf32>
    %407 = arith.divf %406, %25 : vector<8x128xf32>
    %408 = arith.subf %400, %28 : vector<8x128xf32>
    %409 = arith.mulf %408, %405 : vector<8x128xf32>
    %c0_118 = arith.constant 0 : index
    %c0_119 = arith.constant 0 : index
    %c0_120 = arith.constant 0 : index
    %c0_121 = arith.constant 0 : index
    %410 = vector.load %arg3[%c0_118, %c0_119, %c0_120, %c0_121] : memref<1x5x8x128xf32, #tpu.memory_space<vmem>>, vector<1x1x8x128xf32>
    %411 = vector.shape_cast %410 : vector<1x1x8x128xf32> to vector<8x128xf32>
    %412 = vector.shape_cast %409 : vector<8x128xf32> to vector<1x1x8x128xf32>
    tpu.vector_store %arg3[%c0_118, %c0_119, %c0_120, %c0_121], %412 {strides = array<i32>} : memref<1x5x8x128xf32, #tpu.memory_space<vmem>>, vector<1x1x8x128xf32>,
    %413 = arith.subf %403, %31 : vector<8x128xf32>
    %414 = arith.mulf %413, %407 : vector<8x128xf32>
    %c0_122 = arith.constant 0 : index
    %c1_123 = arith.constant 1 : index
    %c0_124 = arith.constant 0 : index
    %c0_125 = arith.constant 0 : index
    %415 = vector.load %arg3[%c0_122, %c1_123, %c0_124, %c0_125] : memref<1x5x8x128xf32, #tpu.memory_space<vmem>>, vector<1x1x8x128xf32>
    %416 = vector.shape_cast %415 : vector<1x1x8x128xf32> to vector<8x128xf32>
    %417 = vector.shape_cast %414 : vector<8x128xf32> to vector<1x1x8x128xf32>
    tpu.vector_store %arg3[%c0_122, %c1_123, %c0_124, %c0_125], %417 {strides = array<i32>} : memref<1x5x8x128xf32, #tpu.memory_space<vmem>>, vector<1x1x8x128xf32>,
    %418 = arith.mulf %394, %405 : vector<8x128xf32>
    %419 = math.log %418 : vector<8x128xf32>
    %c0_126 = arith.constant 0 : index
    %c2_127 = arith.constant 2 : index
    %c0_128 = arith.constant 0 : index
    %c0_129 = arith.constant 0 : index
    %420 = vector.load %arg3[%c0_126, %c2_127, %c0_128, %c0_129] : memref<1x5x8x128xf32, #tpu.memory_space<vmem>>, vector<1x1x8x128xf32>
    %421 = vector.shape_cast %420 : vector<1x1x8x128xf32> to vector<8x128xf32>
    %422 = vector.shape_cast %419 : vector<8x128xf32> to vector<1x1x8x128xf32>
    tpu.vector_store %arg3[%c0_126, %c2_127, %c0_128, %c0_129], %422 {strides = array<i32>} : memref<1x5x8x128xf32, #tpu.memory_space<vmem>>, vector<1x1x8x128xf32>,
    %423 = arith.mulf %397, %407 : vector<8x128xf32>
    %424 = math.log %423 : vector<8x128xf32>
    %c0_130 = arith.constant 0 : index
    %c3_131 = arith.constant 3 : index
    %c0_132 = arith.constant 0 : index
    %c0_133 = arith.constant 0 : index
    %425 = vector.load %arg3[%c0_130, %c3_131, %c0_132, %c0_133] : memref<1x5x8x128xf32, #tpu.memory_space<vmem>>, vector<1x1x8x128xf32>
    %426 = vector.shape_cast %425 : vector<1x1x8x128xf32> to vector<8x128xf32>
    %427 = vector.shape_cast %424 : vector<8x128xf32> to vector<1x1x8x128xf32>
    tpu.vector_store %arg3[%c0_130, %c3_131, %c0_132, %c0_133], %427 {strides = array<i32>} : memref<1x5x8x128xf32, #tpu.memory_space<vmem>>, vector<1x1x8x128xf32>,
    %c0_134 = arith.constant 0 : index
    %c4 = arith.constant 4 : index
    %c0_135 = arith.constant 0 : index
    %c0_136 = arith.constant 0 : index
    %428 = vector.load %arg3[%c0_134, %c4, %c0_135, %c0_136] : memref<1x5x8x128xf32, #tpu.memory_space<vmem>>, vector<1x1x8x128xf32>
    %429 = vector.shape_cast %428 : vector<1x1x8x128xf32> to vector<8x128xf32>
    %430 = vector.shape_cast %391 : vector<8x128xf32> to vector<1x1x8x128xf32>
    tpu.vector_store %arg3[%c0_134, %c4, %c0_135, %c0_136], %430 {strides = array<i32>} : memref<1x5x8x128xf32, #tpu.memory_space<vmem>>, vector<1x1x8x128xf32>,
    return
  }
  func.func @transform_0(%arg0: i32) -> (i32, i32, i32) {
    %c0_i32 = arith.constant 0 : i32
    %c0_i32_0 = arith.constant 0 : i32
    %c0_i32_1 = arith.constant 0 : i32
    %c0_i32_2 = arith.constant 0 : i32
    return %c0_i32, %c0_i32_0, %c0_i32_1 : i32, i32, i32
  }
  func.func @transform_1(%arg0: i32) -> i32 {
    %c0_i32 = arith.constant 0 : i32
    %c0_i32_0 = arith.constant 0 : i32
    return %c0_i32 : i32
  }
  func.func @transform_2(%arg0: i32) -> (i32, i32, i32, i32) {
    %c0_i32 = arith.constant 0 : i32
    %c0_i32_0 = arith.constant 0 : i32
    %c0_i32_1 = arith.constant 0 : i32
    %c0_i32_2 = arith.constant 0 : i32
    return %arg0, %c0_i32, %c0_i32_0, %c0_i32_1 : i32, i32, i32, i32
  }
}

</mosaic_0001>

<bundles_post_ra>
// kernel: _refine_padded.1
= control target key start
LH: loop header
LB: loop body
LE: loop exit
PB: predicated region body
PF: predicated region fallthrough
CT: control target
= control target key end

     0   :  { %s1407_s0 = inlined_call_operand.hbm [shape: f32[4,8,128], index: 0, kind: input, shape index: {}]   ;;  %s1408_s1 = inlined_call_operand.hbm [shape: f32[40], index: 1, kind: input, shape index: {}]   ;;  %s1409_s2 = inlined_call_operand.hbm [shape: f32[2,5,8,128], index: 2, kind: output, shape index: {}]  }
   0x1   :  { %1415 = sst [smem:[#allocation16_spill]] %s1407_s0 }
   0x2   :  { %1416 = sst [smem:[#allocation17_spill]] %s1408_s1 }
   0x3   :  { %7 = vsyncpa [#allocation3], 0 }
   0x4   :  { %8 = vsyncpa [#allocation5], 0 }
   0x5   :  { %9 = vsyncpa [#allocation4], 0 }
   0x6   :  { %11 = vsyncpa [#allocation4 + $0x1], 0  ;;  %s896_s9 = smov 0   ;;  %s898_s10 = smov 0  }
   0x7   :  { %s900_s11 = smov 0   ;;  %s902_s12 = smov 0  }
   0x8 LB: > { %1417 = sst [smem:[#allocation11_spill]] %s860_s9  ;;  %s917_s13 = sadd.s32 4294967295, %s872_s12   ;;  %s872_s12 = sphi %s902_s12, %s1447_s12   ;;  %s868_s11 = sphi %s900_s11, %s1449_s11   ;;  %s864_s10 = sphi %s898_s10, %s1451_s10   ;;  %s860_s9 = sphi %s896_s9, %s1450_s9  }
   0x9   : > { %1418 = sst [smem:[#allocation12_spill]] %s868_s11  ;;  %s658_s14 = sadd.s32 4294967294, %s872_s12  }
   0xa   : > { %s921_s15 = sadd.s32 1, %s872_s12   ;;  %s66_s16 = sadd.s32 1, %s868_s11 }
   0xb   : > { %1419 = sst [smem:[#allocation13_spill]] %s921_s15  ;;  %s63_s17 = ssub.s32 %s872_s12, %s921_s15 }
   0xc   : > { %p76_p0 = scmp.ne.s32.totalorder %s868_s11, %s864_s10  ;;  %p64_p1 = scmp.eq.s32.totalorder %s63_s17, 0 }
   0xd   : > { %p77_p2 = scmp.eq.s32.totalorder %s917_s13, 1  ;;  %p82_p3 = scmp.ne.s32.totalorder %s864_s10, %s860_s9 }
   0xe   : > { %p83_p4 = scmp.eq.s32.totalorder %s658_s14, 1  ;;  %p659_p7 = scmp.ge.s32.totalorder %s872_s12, 1 }
   0xf   : > { %s932_s18 = scalar_select %p64_p1, %s868_s11, %s66_s16  }
  0x10   : > { %p934_p5 = por %p77_p2, %p76_p0  ;;  %p938_p6 = por %p83_p4, %p82_p3 }
  0x11   : > { %1420 = sst [smem:[#allocation14_spill]] %s932_s18  ;;  %p90_p8 = scmp.lt.s32.totalorder %s872_s12, 3 }
  0x12   : > { %s1422_s20 = scalar_select %p938_p6, 1, 0 }
  0x13   : > { %p695_p9 = scmp.eq.s32.totalorder %s917_s13, 0  ;;  %p945_p10 = pnand %p659_p7, %p90_p8 }
  0x14   : > { %1423 = sst [smem:[#allocation15_spill]] %s1422_s20  ;;  %s874_s25 = smov [#allocation2]  }
  0x15   : > { %s1425_s0 = sld [smem:[#allocation16_spill]]  ;;  %p684_p11 = pneg %p945_p10 }
  0x16   : > { %s103_s26 = sshll.u32 %s874_s25, 4  ;;  %s1426_s1 = sld [smem:[#allocation17_spill]]  ;;  %s104_s26 = int_to_ptr.vmem [resolvable:$true] %s103_s26 }
  0x17   : > { %p685_p12 = pnand %p695_p9, %p684_p11  ;;  %s875_s30 = smov 128  }
  0x18   : > { %s876_s3 = smov 8   ;;  %s877_s4 = smov [#allocation6]  }
  0x1a   : > { %129 = sbr.rel (%p945_p10) target bundleno = 253 (0xfd), region = 28 }
  0x1b   : > { %s101_s24 = sshll.u32 %s1425_s0, 4  ;;  %s102_s24 = int_to_ptr.hbm [resolvable:$true] %s101_s24 }
  0x1c   : > { %s116_s29 = sshll.u32 %s1426_s1, 4  ;;  %s117_s29 = int_to_ptr.hbm [resolvable:$true] %s116_s29 }
  0x1d   : > { %687 = dma.hbm_to_vmem [thread:$0]  (!%p685_p12), %s102_s24, 512, %s104_s26, [#allocation3], %s875_s30, %s875_s30, %s876_s3  }
  0x1e   : > { %690 = dma.hbm_to_smem (!%p685_p12), %s117_s29, 16, %s877_s4, [#allocation5]  }
  0x1f   : > { %847 = dma.done.wait (%p695_p9), [#allocation3], 512  }
  0x20   : > { %849 = vsyncadd (%p695_p9), [#allocation3], 4294966784 }
  0x21   : > { %851 = dma.done.wait (%p695_p9), [#allocation5], 16  }
  0x22   : > { %853 = vsyncadd (%p695_p9), [#allocation5], 4294967280 }
  0x23   : > { %141 = sfence }
  0x24   : > { %s970_s5 = smul.u32 20, %s917_s13  ;;  %v980_v0 = vld [vmem:[#allocation2] sm:$0xff]  ;;  %v985_v1 = vld [vmem:[#allocation2 + $0x8] sm:$0xff]  ;;  %v987_v2 = vld [vmem:[#allocation2 + $0x10] sm:$0xff] }
  0x25   : > { %v989_v3 = vld [vmem:[#allocation2 + $0x18] sm:$0xff]  ;;  %v168_v4 = vsub.f32 %v987_v2, %v980_v0  ;;  %vm161_vm0 = vcmp.ge.f32.partialorder %v980_v0, 0.0  ;;  %vm162_vm1 = vcmp.ge.f32.partialorder %v985_v1, 0.0  ;;  %vm164_vm2 = vcmp.le.f32.partialorder %v987_v2, 63.0 }
  0x26   : > { %s307_s6 = sadd.s32 8, %s970_s5  ;;  %s309_s7 = sadd.s32 9, %s970_s5  ;;  %v170_v5 = vsub.f32 %v989_v3, %v985_v1  ;;  %vm166_vm3 = vcmp.le.f32.partialorder %v989_v3, 63.0  ;;  %vm1150_vm6 = vmand %vm161_vm0, %vm162_vm1 }
  0x27   : > { %s974_s8 = sld [smem:[#allocation6 + %s307_s6]]  ;;  %s311_s14 = sadd.s32 10, %s970_s5  ;;  %v1013_v9 = vadd.f32 1.0, %v168_v4  ;;  %vm165_vm10 = vmand %vm1150_vm6, %vm164_vm2 }
  0x28   : > { %s977_s16 = sld [smem:[#allocation6 + %s309_s7]]  ;;  %s313_s17 = sadd.s32 11, %s970_s5  ;;  %v1015_v10 = vadd.f32 1.0, %v170_v5  ;;  %vm1195_vm12 = vmand %vm165_vm10, %vm166_vm3 }
  0x29   : > { %s982_s21 = sld [smem:[#allocation6 + %s311_s14]]  ;;  %s178_s22 = sadd.s32 1, %s970_s5 }
  0x2a   : > { %s991_s23 = sld [smem:[#allocation6 + %s313_s17]]  ;;  %s180_s24 = sadd.s32 2, %s970_s5  ;;  %v1040_v20 = vmul.f32 %v1015_v10, %v1013_v9 }
  0x2b   : > { %s999_s25 = sld [smem:[#allocation6 + %s970_s5]]  ;;  %s182_s26 = sadd.s32 3, %s970_s5 }
  0x2c   : > { %s1002_s27 = sld [smem:[#allocation6 + %s178_s22]]  ;;  %s441_s7 = sadd.s32 16, %s970_s5 }
  0x2d   : > { %v317_v6 = vstv %s974_s8  ;;  %s1005_s28 = sld [smem:[#allocation6 + %s180_s24]]  ;;  %s443_s17 = sadd.s32 17, %s970_s5 }
  0x2e   : > { %v318_v7 = vmax.f32 %v980_v0, %v317_v6  ;;  %v324_v8 = vstv %s977_s16  ;;  %s1011_s29 = sld [smem:[#allocation6 + %s182_s26]]  ;;  %s447_s0 = sadd.s32 19, %s970_s5 }
  0x2f   : > { %v315_v11 = vstv %s982_s21  ;;  %v325_v12 = vmax.f32 %v985_v1, %v324_v8  ;;  %s330_s30 = ssub.f32 %s982_s21, %s974_s8  ;;  %s242_s20 = sadd.s32 5, %s970_s5 }
  0x30   : > { %v316_v13 = vmin.f32 %v987_v2, %v315_v11  ;;  %v322_v14 = vstv %s991_s23  ;;  %s332_s3 = ssub.f32 %s991_s23, %s977_s16  ;;  %s673_s16 = smul.u32 40, %s917_s13 }
  0x31   : > { %v323_v15 = vmin.f32 %v989_v3, %v322_v14  ;;  %s331_s4 = sadd.f32 1.0, %s330_s30  ;;  %v186_v16 = vstv %s999_s25  ;;  %s445_s30 = sadd.s32 18, %s970_s5 }
  0x32   : > { %v319_v17 = vsub.f32 %v316_v13, %v318_v7  ;;  %s333_s6 = sadd.f32 1.0, %s332_s3  ;;  %v187_v18 = vmax.f32 %v980_v0, %v186_v16  ;;  %v193_v19 = vstv %s1002_s27  ;;  %s580_s13 = scalar_lea.hbm %s1409_s2, %s673_s16 }
  0x33   : > { %v326_v21 = vsub.f32 %v323_v15, %v325_v12  ;;  %v184_v22 = vstv %s1005_s28  ;;  %v194_v23 = vmax.f32 %v985_v1, %v193_v19  ;;  %s199_s14 = ssub.f32 %s1005_s28, %s999_s25 }
  0x34   : > { %v320_v24 = vadd.f32 1.0, %v319_v17  ;;  %s334_s22 = smul.f32 %s333_s6, %s331_s4  ;;  %v185_v25 = vmin.f32 %v987_v2, %v184_v22  ;;  %v191_v26 = vstv %s1011_s29  ;;  %s201_s24 = ssub.f32 %s1011_s29, %s1002_s27 }
  0x35   : > { %v327_v27 = vadd.f32 1.0, %v326_v21  ;;  %v192_v28 = vmin.f32 %v989_v3, %v191_v26  ;;  %s200_s26 = sadd.f32 1.0, %s199_s14  ;;  %s374_s6 = sadd.s32 12, %s970_s5 }
  0x36   : > { %v321_v29 = vmax.f32 %v320_v24, 0.0  ;;  %v335_v30 = vstv %s334_s22  ;;  %v188_v31 = vsub.f32 %v185_v25, %v187_v18  ;;  %s202_s3 = sadd.f32 1.0, %s201_s24  ;;  %s376_s22 = sadd.s32 13, %s970_s5 }
  0x37   : > { %v328_v32 = vmax.f32 %v327_v27, 0.0  ;;  %v336_v33 = vadd.f32 %v335_v30, %v1040_v20  ;;  %v195_v34 = vsub.f32 %v192_v28, %v194_v23  ;;  %s1061_s4 = sld [smem:[#allocation6 + %s441_s7]]  ;;  %s378_s24 = sadd.s32 14, %s970_s5 }
  0x38   : > { %v189_v35 = vadd.f32 1.0, %v188_v31  ;;  %s203_s1 = smul.f32 %s202_s3, %s200_s26  ;;  %s1064_s18 = sld [smem:[#allocation6 + %s443_s17]] }
  0x39   : > { %v1066_v36 = vmul.f32 %v328_v32, %v321_v29  ;;  %v196_v37 = vadd.f32 1.0, %v195_v34  ;;  %s1068_s14 = sld [smem:[#allocation6 + %s445_s30]]  ;;  %s380_s26 = sadd.s32 15, %s970_s5 }
  0x3a   : > { %v190_v38 = vmax.f32 %v189_v35, 0.0  ;;  %v204_v39 = vstv %s203_s1  ;;  %s1071_s7 = sld [smem:[#allocation6 + %s447_s0]]  ;;  %s583_s27 = sshll.u32 %s580_s13, 4  ;;  %s584_s27 = int_to_ptr.hbm [resolvable:$true] %s583_s27 }
  0x3b   : > { %v1075_v40 = vsub.f32 %v336_v33, %v1066_v36  ;;  %v197_v41 = vmax.f32 %v196_v37, 0.0  ;;  %s1077_s17 = sld [smem:[#allocation6 + %s374_s6]]  ;;  %v205_v42 = vadd.f32 %v204_v39, %v1040_v20  ;;  %s816_s29 = sshra.s32 %s584_s27, 4  ;;  %s817_s29 = int_to_ptr.hbm [resolvable:$true] %s816_s29 }
  0x3c   : > { %s1081_s1 = sld [smem:[#allocation6 + %s376_s22]]  ;;  %p823_p2 = scmp.lt.s32.totalorder %s817_s29, %s1409_s2 }
  0x3d   : > { %739 = vrcp.f32 %v1075_v40  ;;  %s1084_s0 = sld [smem:[#allocation6 + %s378_s24]]  ;;  %v1086_v43 = vmul.f32 %v197_v41, %v190_v38  ;;  %v451_v44 = vstv %s1061_s4  ;;  %vm343_vm4 = vweird.f32 %v1075_v40 }
  0x3e   : > { %v458_v45 = vstv %s1064_s18  ;;  %s1090_s30 = sld [smem:[#allocation6 + %s380_s26]]  ;;  %v452_v47 = vmax.f32 %v980_v0, %v451_v44  ;;  %v347_v60 = vand.u32 2147483647, %v1075_v40  ;;  %v349_v61 = vand.u32 2147483648, %v1075_v40 }
  0x3f   : > { %v449_v46 = vstv %s1068_s14  ;;  %s464_s3 = ssub.f32 %s1068_s14, %s1061_s4  ;;  %v1099_v48 = vsub.f32 %v205_v42, %v1086_v43  ;;  %v459_v51 = vmax.f32 %v985_v1, %v458_v45  ;;  %s818_s4 = scalar_lea.hbm %s817_s29, 40 }
  0x40   : > { %v450_v49 = vmin.f32 %v987_v2, %v449_v46  ;;  %v456_v50 = vstv %s1071_s7  ;;  %s466_s6 = ssub.f32 %s1071_s7, %s1064_s18  ;;  %vm1158_vm7 = vcmp.eq.f32.partialorder %v347_v60, 8.507059e+37  ;;  %v350_v29 = vor.u32 1.1754944e-38, %v349_v61  ;;  %p819_p13 = scmp.ne.s32.totalorder %s817_s29, %s818_s4 }
  0x41   : > { %v457_v52 = vmin.f32 %v989_v3, %v456_v50  ;;  %s465_s22 = sadd.f32 1.0, %s464_s3  ;;  %v384_v53 = vstv %s1077_s17  ;;  %741 = vrcp.f32 %v1099_v48  ;;  %s240_s3 = sadd.s32 4, %s970_s5  ;;  %vm212_vm9 = vweird.f32 %v1099_v48 }
  0x42   : > { %s467_s24 = sadd.f32 1.0, %s466_s6  ;;  %v453_v55 = vsub.f32 %v450_v49, %v452_v47  ;;  %v385_v58 = vmax.f32 %v980_v0, %v384_v53  ;;  %v391_v15 = vstv %s1081_s1  ;;  %v216_v37 = vand.u32 2147483647, %v1099_v48  ;;  %p820_p0 = pnand %p819_p13, %p934_p5 }
  0x43   : > { %v740_v54 = vpop.eup %739  ;;  %v460_v56 = vsub.f32 %v457_v52, %v459_v51  ;;  %v382_v57 = vstv %s1084_s0  ;;  %s397_s26 = ssub.f32 %s1084_s0, %s1077_s17  ;;  %v392_v30 = vmax.f32 %v985_v1, %v391_v15  ;;  %v218_v38 = vand.u32 2147483648, %v1099_v48  ;;  %s822_s17 = scalar_lea.hbm %s1409_s2, 80 }
  0x44   : > { %v339_v59 = vmul.f32 %v740_v54, %v1075_v40  ;;  %vm344_vm5 = vweird.f32 %v740_v54  ;;  %s468_s6 = smul.f32 %s467_s24, %s465_s22  ;;  %s399_s11 = ssub.f32 %s1090_s30, %s1081_s1  ;;  %v454_v62 = vadd.f32 1.0, %v453_v55  ;;  %v383_v4 = vmin.f32 %v987_v2, %v382_v57 }
  0x45   : > { %v461_v63 = vadd.f32 1.0, %v460_v56  ;;  %v389_v5 = vstv %s1090_s30  ;;  %s1136_s15 = sadd.f32 1.0, %s397_s26  ;;  %s244_s24 = sadd.s32 6, %s970_s5  ;;  %vm1172_vm8 = vmor %vm343_vm4, %vm344_vm5  ;;  %vm217_vm14 = vcmp.eq.f32.partialorder %v216_v37, 8.507059e+37 }
  0x46   : > { %v340_v7 = vsub.f32 1.0, %v339_v59  ;;  %v469_v12 = vstv %s468_s6  ;;  %v390_v13 = vmin.f32 %v989_v3, %v389_v5  ;;  %s1143_s22 = sadd.f32 1.0, %s399_s11  ;;  %v455_v18 = vmax.f32 %v454_v62, 0.0  ;;  %s246_s6 = sadd.s32 7, %s970_s5 }
  0x47   : > { %v462_v21 = vmax.f32 %v461_v63, 0.0  ;;  %v470_v23 = vadd.f32 %v469_v12, %v1040_v20  ;;  %v386_v24 = vsub.f32 %v383_v4, %v385_v58  ;;  %s1155_s26 = sld [smem:[#allocation6 + %s240_s3]]  ;;  %v742_v25 = vpop.eup %741  ;;  %v219_v59 = vor.u32 1.1754944e-38, %v218_v38  ;;  %p821_p1 = pneg %p820_p0 }
  0x48   : > { %v341_v27 = vmul.f32 %v740_v54, %v340_v7  ;;  %s401_s11 = smul.f32 %s1143_s22, %s1136_s15  ;;  %s1167_s9 = sld [smem:[#allocation6 + %s242_s20]]  ;;  %v208_v32 = vmul.f32 %v742_v25, %v1099_v48  ;;  %v393_v39 = vsub.f32 %v390_v13, %v392_v30  ;;  %vm213_vm11 = vweird.f32 %v742_v25 }
  0x49   : > { %v1178_v33 = vmul.f32 %v462_v21, %v455_v18  ;;  %v387_v34 = vadd.f32 1.0, %v386_v24  ;;  %s1180_s5 = sld [smem:[#allocation6 + %s244_s24]]  ;;  %vm1206_vm13 = vmor %vm212_vm9, %vm213_vm11  ;;  %p824_p3 = scmp.lt.s32.totalorder %s822_s17, %s818_s4 }
  0x4a   : > { %v342_v35 = vadd.f32 %v740_v54, %v341_v27  ;;  %s1188_s15 = sld [smem:[#allocation6 + %s246_s6]]  ;;  %v209_v40 = vsub.f32 1.0, %v208_v32  ;;  %v402_v42 = vstv %s401_s11  ;;  %v394_v51 = vadd.f32 1.0, %v393_v39 }
  0x4b   : > { %v471_v41 = vsub.f32 %v470_v23, %v1178_v33  ;;  %v388_v49 = vmax.f32 %v387_v34, 0.0  ;;  %v403_v61 = vadd.f32 %v402_v42, %v1040_v20  ;;  %p825_p4 = por %p824_p3, %p823_p2 }
  0x4c   : > { %v346_v47 = vsel %vm1172_vm8, %v740_v54, %v342_v35  ;;  %v210_v56 = vmul.f32 %v742_v25, %v209_v40  ;;  %v395_v60 = vmax.f32 %v394_v51, 0.0 }
  0x4d   : > { %v351_v55 = vsel %vm1158_vm7, %v350_v29, %v346_v47  ;;  %743 = vrcp.f32 %v471_v41  ;;  %v250_v4 = vstv %s1155_s26  ;;  %v483_v31 = vand.u32 2147483648, %v471_v41  ;;  %p826_p7 = pnand %p825_p4, %p821_p1 }
  0x4e   : > { %v1202_v54 = vmul.f32 %v351_v55, %v1066_v36  ;;  %v211_v62 = vadd.f32 %v742_v25, %v210_v56  ;;  %v396_v48 = vmul.f32 %v395_v60, %v388_v49  ;;  %v257_v7 = vstv %s1167_s9 }
  0x4f   : > { %v248_v63 = vstv %s1180_s5  ;;  %s263_s20 = ssub.f32 %s1180_s5, %s1155_s26  ;;  %v251_v17 = vmax.f32 %v980_v0, %v250_v4  ;;  %vm477_vm15 = vweird.f32 %v471_v41  ;;  %v484_v40 = vor.u32 1.1754944e-38, %v483_v31 }
  0x50   : > { %v353_v36 = vsel %vm1195_vm12, %v1202_v54, -1.0  ;;  %s265_s3 = ssub.f32 %s1188_s15, %s1167_s9  ;;  %v215_v12 = vsel %vm1206_vm13, %v742_v25, %v211_v62  ;;  %v249_v13 = vmin.f32 %v987_v2, %v248_v63  ;;  %v255_v18 = vstv %s1188_s15  ;;  %s150_s9 = sand.u32 1, %s864_s10  }
  0x51   : > { %354 = vmax.xlane.f32.xlu1 %v353_v36  ;;  %s264_s22 = sadd.f32 1.0, %s263_s20  ;;  %v220_v21 = vsel %vm217_vm14, %v219_v59, %v215_v12  ;;  %v404_v23 = vsub.f32 %v403_v61, %v396_v48  ;;  %v256_v28 = vmin.f32 %v989_v3, %v255_v18  ;;  %v258_v2 = vmax.f32 %v985_v1, %v257_v7  ;;  %s672_s18 = smul.u32 40, %s150_s9 }
  0x52   : > { %s266_s24 = sadd.f32 1.0, %s265_s3  ;;  %v1231_v27 = vmul.f32 %v220_v21, %v1086_v43  ;;  %v252_v25 = vsub.f32 %v249_v13, %v251_v17  ;;  %v481_v43 = vand.u32 2147483647, %v471_v41  ;;  %s569_s28 = scalar_lea.sflag [#allocation4], %s150_s9 }
  0x53   : > { %v744_v24 = vpop.eup %743  ;;  %745 = vrcp.f32 %v404_v23  ;;  %v259_v35 = vsub.f32 %v256_v28, %v258_v2  ;;  %vm410_vm3 = vweird.f32 %v404_v23  ;;  %v416_v55 = vand.u32 2147483648, %v404_v23  ;;  %s1343_s8 = scalar_lea.vmem [#allocation7], %s672_s18 }
  0x54   : > { %v473_v29 = vmul.f32 %v744_v24, %v471_v41  ;;  %v222_v30 = vsel %vm1195_vm12, %v1231_v27, -1.0  ;;  %s267_s6 = smul.f32 %s266_s24, %s264_s22  ;;  %vm478_vm0 = vweird.f32 %v744_v24  ;;  %v253_v34 = vadd.f32 1.0, %v252_v25  ;;  %s581_s25 = sshll.u32 %s1343_s8, 4  ;;  %s582_s25 = int_to_ptr.vmem [resolvable:$true] %s581_s25 }
  0x55   : > { %223 = vmax.xlane.f32.xlu0 %v222_v30  ;;  %vm1242_vm1 = vmor %vm477_vm15, %vm478_vm0  ;;  %v260_v47 = vadd.f32 1.0, %v259_v35  ;;  %vm482_vm2 = vcmp.eq.f32.partialorder %v481_v43, 8.507059e+37  ;;  %v414_v60 = vand.u32 2147483647, %v404_v23  ;;  %v417_v13 = vor.u32 1.1754944e-38, %v416_v55 }
  0x56   : > { %v474_v32 = vsub.f32 1.0, %v473_v29  ;;  %v268_v37 = vstv %s267_s6  ;;  %v254_v42 = vmax.f32 %v253_v34, 0.0  ;;  %vm234_vm10 = vcmp.gt.f32.partialorder %v1231_v27, -1.0 }
  0x57   : > { %v261_v56 = vmax.f32 %v260_v47, 0.0  ;;  %v269_v41 = vadd.f32 %v268_v37, %v1040_v20  ;;  %vm415_vm6 = vcmp.eq.f32.partialorder %v414_v60, 8.507059e+37  ;;  %v235_v35 = vsel %vm234_vm10, %v1231_v27, -1.0 }
  0x58   : > { %v475_v3 = vmul.f32 %v744_v24, %v474_v32  ;;  %v236_v37 = vsel %vm234_vm10, %v186_v16, 0.0  ;;  %v238_v39 = vsel %vm234_vm10, %v184_v22, 0.0 }
  0x59   : > { %v746_v38 = vpop.eup %745  ;;  %v262_v62 = vmul.f32 %v261_v56, %v254_v42  ;;  %v239_v42 = vsel %vm234_vm10, %v191_v26, 0.0 }
  0x5a   : > { %v476_v49 = vadd.f32 %v744_v24, %v475_v3  ;;  %v406_v51 = vmul.f32 %v746_v38, %v404_v23  ;;  %vm411_vm4 = vweird.f32 %v746_v38 }
  0x5b   : > { %vm412_vm5 = vmor %vm410_vm3, %vm411_vm4  ;;  %v270_v17 = vsub.f32 %v269_v41, %v262_v62  ;;  %vm539_vm4 = vweird.f32 %v1015_v10 }
  0x5c   : > { %v480_v58 = vsel %vm1242_vm1, %v744_v24, %v476_v49  ;;  %v407_v59 = vsub.f32 1.0, %v406_v51  ;;  %vm524_vm1 = vweird.f32 %v1013_v9 }
  0x5d   : > { %v485_v61 = vsel %vm482_vm2, %v484_v40, %v480_v58  ;;  %747 = vrcp.f32 %v270_v17  ;;  %v282_v2 = vand.u32 2147483648, %v270_v17  ;;  %vm276_vm7 = vweird.f32 %v270_v17 }
  0x5e   : > { %v1250_v36 = vmul.f32 %v485_v61, %v1178_v33  ;;  %v408_v12 = vmul.f32 %v746_v38, %v407_v59  ;;  %v280_v31 = vand.u32 2147483647, %v270_v17  ;;  %749 = vrcp.f32 %v1013_v9 }
  0x5f   : > { %751 = vrcp.f32 %v1015_v10 }
  0x60   : > { %v487_v21 = vsel %vm1195_vm12, %v1250_v36, -1.0  ;;  %v409_v20 = vadd.f32 %v746_v38, %v408_v12  ;;  %vm281_vm11 = vcmp.eq.f32.partialorder %v280_v31, 8.507059e+37 }
  0x61   : > { %488 = vmax.xlane.f32.xlu2 %v487_v21 }
  0x62   : > { %v413_v24 = vsel %vm412_vm5, %v746_v38, %v409_v20  ;;  %v237_v38 = vsel %vm234_vm10, %v193_v19, 0.0 }
  0x63   : > { %v418_v28 = vsel %vm415_vm6, %v417_v13, %v413_v24  ;;  %v748_v29 = vpop.eup %747  ;;  %v543_v24 = vand.u32 2147483647, %v1015_v10 }
  0x64   : > { %v1255_v23 = vmul.f32 %v418_v28, %v396_v48  ;;  %v272_v25 = vmul.f32 %v748_v29, %v270_v17  ;;  %vm277_vm8 = vweird.f32 %v748_v29  ;;  %v283_v48 = vor.u32 1.1754944e-38, %v282_v2 }
  0x65   : > { %vm278_vm9 = vmor %vm276_vm7, %vm277_vm8  ;;  %v172_v2 = vmul.f32 0.5, %v1013_v9  ;;  %vm544_vm8 = vcmp.eq.f32.partialorder %v543_v24, 8.507059e+37 }
  0x66   : > { %v420_v33 = vsel %vm1195_vm12, %v1255_v23, -1.0  ;;  %v273_v30 = vsub.f32 1.0, %v272_v25  ;;  %v545_v25 = vand.u32 2147483648, %v1015_v10 }
  0x67   : > { %421 = vmax.xlane.f32.xlu1 %v420_v33 }
  0x68   : > { %v274_v32 = vmul.f32 %v748_v29, %v273_v30  ;;  %v174_v30 = vmul.f32 0.5, %v1015_v10 }
  0x6a   : > { %v275_v43 = vadd.f32 %v748_v29, %v274_v32 }
  0x6c   : > { %v279_v34 = vsel %vm278_vm9, %v748_v29, %v275_v43  ;;  %vm232_vm9 = vcmp.ge.f32.partialorder %v1231_v27, 0.7 }
  0x6d   : > { %v284_v3 = vsel %vm281_vm11, %v283_v48, %v279_v34  ;;  %vm233_vm11 = vcmp.ge.f32.partialorder %v1231_v27, 0.3 }
  0x6e   : > { %v1268_v40 = vmul.f32 %v284_v3, %v262_v62  ;;  %v175_v3 = vadd.f32 %v174_v30, %v985_v1  ;;  %v878_v30 = vmov 0.0  }
  0x70   : > { %v286_v47 = vsel %vm1195_vm12, %v1268_v40, -1.0  ;;  %vm301_vm13 = vcmp.gt.f32.partialorder %v1268_v40, %v235_v35  ;;  %vm297_vm10 = vcmp.ge.f32.partialorder %v1268_v40, 0.7 }
  0x71   : > { %v302_v16 = vsel %vm301_vm13, %v1268_v40, %v235_v35  ;;  %v303_v19 = vsel %vm301_vm13, %v250_v4, %v236_v37  ;;  %v304_v22 = vsel %vm301_vm13, %v257_v7, %v237_v38  ;;  %v305_v49 = vsel %vm301_vm13, %v248_v63, %v238_v39  ;;  %287 = vmax.xlane.f32.xlu0 %v286_v47 }
  0x72   : > { %v306_v26 = vsel %vm301_vm13, %v255_v18, %v239_v42  ;;  %vm368_vm14 = vcmp.gt.f32.partialorder %v1202_v54, %v302_v16  ;;  %v173_v35 = vadd.f32 %v172_v2, %v980_v0  ;;  %vm299_vm13 = vcmp.ge.f32.partialorder %v1268_v40, 0.3 }
  0x73   : > { %v369_v51 = vsel %vm368_vm14, %v1202_v54, %v302_v16  ;;  %v370_v55 = vsel %vm368_vm14, %v317_v6, %v303_v19  ;;  %v371_v56 = vsel %vm368_vm14, %v324_v8, %v304_v22  ;;  %v372_v41 = vsel %vm368_vm14, %v315_v11, %v305_v49  ;;  %v750_v8 = vpop.eup %749 }
  0x74   : > { %v373_v4 = vsel %vm368_vm14, %v322_v14, %v306_v26  ;;  %vm435_vm15 = vcmp.gt.f32.partialorder %v1255_v23, %v369_v51  ;;  %v520_v11 = vmul.f32 %v750_v8, %v1013_v9  ;;  %v752_v14 = vpop.eup %751  ;;  %vm525_vm2 = vweird.f32 %v750_v8  ;;  %vm298_vm14 = vmor %vm232_vm9, %vm297_vm10 }
  0x75   : > { %v437_v63 = vsel %vm435_vm15, %v384_v53, %v370_v55  ;;  %v438_v7 = vsel %vm435_vm15, %v391_v15, %v371_v56  ;;  %v439_v18 = vsel %vm435_vm15, %v382_v57, %v372_v41  ;;  %v440_v6 = vsel %vm435_vm15, %v389_v5, %v373_v4  ;;  %vm1319_vm3 = vmor %vm524_vm1, %vm525_vm2 }
  0x76   : > { %v436_v58 = vsel %vm435_vm15, %v1255_v23, %v369_v51  ;;  %v521_v59 = vsub.f32 1.0, %v520_v11  ;;  %v535_v62 = vmul.f32 %v752_v14, %v1015_v10  ;;  %vm540_vm5 = vweird.f32 %v752_v14 }
  0x77   : > { %vm502_vm0 = vcmp.gt.f32.partialorder %v1250_v36, %v436_v58  ;;  %vm1333_vm7 = vmor %vm539_vm4, %vm540_vm5  ;;  %v546_v10 = vor.u32 1.1754944e-38, %v545_v25  ;;  %vm364_vm15 = vcmp.ge.f32.partialorder %v1202_v54, 0.7  ;;  %vm366_vm1 = vcmp.ge.f32.partialorder %v1202_v54, 0.3 }
  0x78   : > { %v503_v53 = vsel %vm502_vm0, %v451_v44, %v437_v63  ;;  %v504_v15 = vsel %vm502_vm0, %v458_v45, %v438_v7  ;;  %v505_v57 = vsel %vm502_vm0, %v449_v46, %v439_v18  ;;  %v506_v5 = vsel %vm502_vm0, %v456_v50, %v440_v6  ;;  %vm300_vm0 = vmor %vm233_vm11, %vm299_vm13 }
  0x79   : > { %v511_v60 = vsub.f32 %v505_v57, %v503_v53  ;;  %v522_v61 = vmul.f32 %v750_v8, %v521_v59  ;;  %v513_v12 = vsub.f32 %v506_v5, %v504_v15  ;;  %v528_v44 = vand.u32 2147483647, %v1013_v9  ;;  %vm365_vm2 = vmor %vm298_vm14, %vm364_vm15 }
  0x7a   : > { %v530_v45 = vand.u32 2147483648, %v1013_v9  ;;  %v536_v50 = vsub.f32 1.0, %v535_v62  ;;  %vm367_vm4 = vmor %vm300_vm0, %vm366_vm1  ;;  %vm433_vm5 = vcmp.ge.f32.partialorder %v1255_v23, 0.3  ;;  %vm500_vm9 = vcmp.ge.f32.partialorder %v1250_v36, 0.3 }
  0x7b   : > { %v523_v13 = vadd.f32 %v750_v8, %v522_v61  ;;  %vm529_vm6 = vcmp.eq.f32.partialorder %v528_v44, 8.507059e+37  ;;  %v512_v28 = vadd.f32 1.0, %v511_v60  ;;  %v514_v33 = vadd.f32 1.0, %v513_v12 }
  0x7c   : > { %v531_v20 = vor.u32 1.1754944e-38, %v530_v45  ;;  %v537_v29 = vmul.f32 %v752_v14, %v536_v50 }
  0x7d   : > { %v527_v21 = vsel %vm1319_vm3, %v750_v8, %v523_v13  ;;  %v515_v32 = vmul.f32 0.5, %v512_v28  ;;  %v517_v48 = vmul.f32 0.5, %v514_v33  ;;  %vm431_vm3 = vcmp.ge.f32.partialorder %v1255_v23, 0.7 }
  0x7e   : > { %v532_v43 = vsel %vm529_vm6, %v531_v20, %v527_v21  ;;  %v538_v34 = vadd.f32 %v752_v14, %v537_v29  ;;  %vm432_vm6 = vmor %vm365_vm2, %vm431_vm3 }
  0x7f   : > { %v516_v37 = vadd.f32 %v515_v32, %v503_v53  ;;  %v518_v38 = vadd.f32 %v517_v48, %v504_v15  ;;  %v556_v39 = vmul.f32 %v532_v43, %v512_v28 }
  0x80   : > { %v542_v9 = vsel %vm1333_vm7, %v752_v14, %v538_v34  ;;  %vm498_vm7 = vcmp.ge.f32.partialorder %v1250_v36, 0.7 }
  0x81   : > { %v547_v47 = vsel %vm544_vm8, %v546_v10, %v542_v9  ;;  %v549_v16 = vsub.f32 %v516_v37, %v173_v35  ;;  %v552_v19 = vsub.f32 %v518_v38, %v175_v3  ;;  %753 = vlog2.f32 %v556_v39  ;;  %vm434_vm8 = vmor %vm367_vm4, %vm433_vm5 }
  0x82   : > { %v561_v22 = vmul.f32 %v547_v47, %v514_v33  ;;  %vm1360_vm10 = vmor %vm432_vm6, %vm498_vm7 }
  0x83   : > { %v550_v26 = vmul.f32 %v549_v16, %v532_v43  ;;  %v553_v51 = vmul.f32 %v552_v19, %v547_v47  ;;  %vm501_vm13 = vmor %vm434_vm8, %vm500_vm9 }
  0x84   : > { %755 = vlog2.f32 %v561_v22  ;;  %v509_v31 = vsel %vm501_vm13, -1.0, %v878_v30 }
  0x85   : > { %551 = vst [vmem:[%s1343_s8] sm:$0xff] %v550_v26 }
  0x86   : > { %665 = vst [vmem:[%s1343_s8 + $0x8] sm:$0xff] %v553_v51 }
  0x87   : > { %v754_v4 = vpop.eup %753 }
  0x88   : > { %v558_v18 = vmul.f32 0.6931472, %v754_v4 }
  0x8a   : > { %v756_v6 = vpop.eup %755  ;;  %666 = vst [vmem:[%s1343_s8 + $0x10] sm:$0xff] %v558_v18 }
  0x8b   : > { %v563_v14 = vmul.f32 0.6931472, %v756_v6 }
  0x8d   : > { %667 = vst [vmem:[%s1343_s8 + $0x18] sm:$0xff] %v563_v14 }
  0xc4   : > { %v355_v46 = vpop.xlane.xlu1 %354 }
  0xc5   : > { %v356_v1 = vrot.slane %v355_v46, 4 }
  0xc7   : > { %v357_v7 = vmax.f32 %v355_v46, %v356_v1 }
  0xc8   : > { %v224_v42 = vpop.xlane.xlu0 %223 }
  0xc9   : > { %v225_v0 = vrot.slane %v224_v42, 4  ;;  %v358_v59 = vrot.slane %v357_v7, 2 }
  0xcb   : > { %v226_v63 = vmax.f32 %v224_v42, %v225_v0  ;;  %v359_v61 = vmax.f32 %v357_v7, %v358_v59 }
  0xcd   : > { %v227_v58 = vrot.slane %v226_v63, 2  ;;  %v360_v45 = vrot.slane %v359_v61, 1 }
  0xcf   : > { %v228_v5 = vmax.f32 %v226_v63, %v227_v58  ;;  %v361_v28 = vmax.f32 %v359_v61, %v360_v45 }
  0xd1   : > { %v229_v17 = vrot.slane %v228_v5, 1  ;;  %vm362_vm15 = vcmp.eq.f32.partialorder %v1202_v54, %v361_v28 }
  0xd3   : > { %v230_v20 = vmax.f32 %v228_v5, %v229_v17 }
  0xd4   : > { %v489_v55 = vpop.xlane.xlu2 %488 }
  0xd5   : > { %v490_v41 = vrot.slane %v489_v55, 4  ;;  %vm231_vm11 = vcmp.eq.f32.partialorder %v1231_v27, %v230_v20 }
  0xd7   : > { %v491_v11 = vmax.f32 %v489_v55, %v490_v41 }
  0xd9   : > { %v492_v15 = vrot.slane %v491_v11, 2 }
  0xda   : > { %v422_v49 = vpop.xlane.xlu1 %421 }
  0xdb   : > { %v423_v56 = vrot.slane %v422_v49, 4  ;;  %v493_v13 = vmax.f32 %v491_v11, %v492_v15 }
  0xdd   : > { %v424_v8 = vmax.f32 %v422_v49, %v423_v56  ;;  %v494_v21 = vrot.slane %v493_v13, 1 }
  0xdf   : > { %v425_v53 = vrot.slane %v424_v8, 2  ;;  %v495_v25 = vmax.f32 %v493_v13, %v494_v21 }
  0xe1   : > { %v426_v62 = vmax.f32 %v424_v8, %v425_v53  ;;  %vm496_vm3 = vcmp.eq.f32.partialorder %v1250_v36, %v495_v25 }
  0xe3   : > { %v427_v46 = vrot.slane %v426_v62, 1 }
  0xe4   : > { %v288_v57 = vpop.xlane.xlu0 %287 }
  0xe5   : > { %v289_v60 = vrot.slane %v288_v57, 4  ;;  %v428_v33 = vmax.f32 %v426_v62, %v427_v46 }
  0xe7   : > { %v290_v12 = vmax.f32 %v288_v57, %v289_v60  ;;  %vm429_vm1 = vcmp.eq.f32.partialorder %v1255_v23, %v428_v33 }
  0xe9   : > { %v291_v44 = vrot.slane %v290_v12, 2 }
  0xeb   : > { %v292_v50 = vmax.f32 %v290_v12, %v291_v44 }
  0xed   : > { %v293_v24 = vrot.slane %v292_v50, 1 }
  0xef   : > { %v294_v29 = vmax.f32 %v292_v50, %v293_v24 }
  0xf1   : > { %vm295_vm14 = vcmp.eq.f32.partialorder %v1268_v40, %v294_v29 }
  0xf2   : > { %vm296_vm0 = vmor %vm231_vm11, %vm295_vm14 }
  0xf3   : > { %vm363_vm2 = vmor %vm296_vm0, %vm362_vm15 }
  0xf4   : > { %vm430_vm4 = vmor %vm363_vm2, %vm429_vm1 }
  0xf5   : > { %vm497_vm5 = vmor %vm430_vm4, %vm496_vm3 }
  0xf6   : > { %vm507_vm6 = vmand %vm497_vm5, %vm1195_vm12 }
  0xf7   : > { %vm508_vm7 = vmor %vm507_vm6, %vm1360_vm10 }
  0xf8   : > { %v510_v54 = vsel %vm508_vm7, 1.0, %v509_v31 }
  0xf9   : > { %668 = vst [vmem:[%s1343_s8 + $0x20] sm:$0xff] %v510_v54 }
  0xfa   : > { %829 = shalt.err (!%p826_p7)
}
  0xfb   : > { %s879_s30 = smov 128   ;;  %s880_s26 = smov 8  }
  0xfc   : > { %682 = dma.vmem_to_hbm [thread:$0]  (%p934_p5), %s582_s25, 640, %s584_s27, %s569_s28, %s879_s30, %s879_s30, %s880_s26  }
  0xfd PF: > { %s1445_s11 = sld [smem:[#allocation11_spill]]  ;;  %p699_p8 = scmp.ge.s32.totalorder %s872_s12, 2 }
  0xff   : > { %p692_p9 = pnand %p699_p8, %p938_p6 }
 0x101   : > { %p693_p10 = pneg %p692_p9 }
 0x103   : > { %s598_s15 = sand.u32 1, %s1445_s11  }
 0x104   : > { %s599_s20 = scalar_lea.sflag [#allocation4], %s598_s15 }
 0x105   : > { %855 = dma.done.wait (%p693_p10), %s599_s20, 640  }
 0x106   : > { %857 = vsyncadd (%p693_p10), %s599_s20, 4294966656  ;;  %s1447_s12 = sld [smem:[#allocation13_spill]]  ;;  %s1450_s9 = smov %s864_s10 }
 0x107   : > { %s1448_s3 = sld [smem:[#allocation12_spill]] }
 0x108   : > { %s1449_s11 = sld [smem:[#allocation14_spill]] }
 0x10c   : > { %p14_p11 = scmp.ge.s32.totalorder %s1447_s12, 4  }
 0x10d   : > { %s1451_s10 = smov %s1448_s3 }
 0x10e   :  { %16 = sbr.rel (!%p14_p11) target bundleno = 8 (0x8), region = 77 }
 0x113   :  { %605 = vsyncpa [#allocation3], 1 }
 0x114   :  { %607 = vsyncpa [#allocation3 + $0x1], 1 }
 0x115   :  { %608 = vsyncpa [#allocation4], 1 }
 0x116   :  { %610 = vsyncpa [#allocation4 + $0x1], 1 }
 0x117   :  { %611 = vsyncpa [#allocation5], 1 }
 0x118   :  { %613 = vsyncpa [#allocation5 + $0x1], 1 }

</bundles_post_ra>
